<compile_context>
chip_gen: v6e
topology: v6e:2x2x1
jax: 0.10.0
libtpu: 0.0.40
codegen_flags: <defaults>
</compile_context>

<pallas_src>
import functools

import numpy as np

import jax
import jax.numpy as jnp
from jax import lax
from jax.experimental import pallas as pl
from jax.experimental.pallas import tpu as pltpu


def _round_up(x, m):
    return (x + m - 1) // m * m


# ----------------------------------------------------------------------------
# Parameter preparation (done once, outside the jitted forward)
# ----------------------------------------------------------------------------
def _repack_conv_weight(w_oihw):
    """(Cout, Cin, 4, 4) OIHW weight of a k4/s2 conv -> (4, 4*Cin, Cout) bf16.

    Tap t = a*2+b of the equivalent 2x2 stride-1 conv over the space-to-depth'd
    (padded) input; K index = (ri*2+rj)*Cin + ci matches _to_phase's channel order.
    """
    co, ci, kh, kw = w_oihw.shape
    assert kh == 4 and kw == 4, "encoder convs are all 4x4 / stride 2"
    w = w_oihw.reshape(co, ci, 2, 2, 2, 2)        # (co, ci, a, ri, b, rj)
    w = jnp.transpose(w, (2, 4, 3, 5, 1, 0))      # (a, b, ri, rj, ci, co)
    return w.reshape(4, 4 * ci, co).astype(jnp.bfloat16)


def prepare_params(params):
    """Repack conv weights and pre-concatenate / zero-pad the dense heads."""
    convs = [(_repack_conv_weight(wc), bc.reshape(1, -1).astype(jnp.float32))
             for (wc, bc) in params["convs"]]
    w1, b1 = params["dense1"]
    w2, b2 = params["dense2"]
    k, nz = w1.shape
    n_pad = _round_up(2 * nz, 128)                # lane-dense logit width
    wcat = jnp.zeros((k, n_pad), jnp.float32)
    wcat = wcat.at[:, :nz].set(w1).at[:, nz:2 * nz].set(w2)
    bcat = jnp.zeros((1, n_pad), jnp.float32)
    bcat = bcat.at[0, :nz].set(b1).at[0, nz:2 * nz].set(b2)
    return {"convs": convs, "head_w": wcat, "head_b": bcat}


# ----------------------------------------------------------------------------
# Glue: pad(1) + space-to-depth(2) phase tensor (same byte count as the activation)
# ----------------------------------------------------------------------------
def _space_to_depth2(x):
    """(N, H2, W2, C) -> (N, H2//2, W2//2, 4C); channel index = (ri*2+rj)*C + ci."""
    n, h2, w2, c = x.shape
    x = x.reshape(n, h2 // 2, 2, w2 // 2, 2, c)
    x = jnp.transpose(x, (0, 1, 3, 2, 4, 5))
    return x.reshape(n, h2 // 2, w2 // 2, 4 * c)


def _to_phase(x_nhwc):
    """(n,h,w,c) NHWC -> ((n, R_pad, 4c) bf16 phase tensor, ho, wo).

    Rows are the flattened (hp*wp) phase grid of the 1-padded input, zero-padded to
    R_pad >= hp*wp + 1 (multiple of 8) so every shifted tap slice inside the kernel
    is statically in bounds.
    """
    n, h, w, c = x_nhwc.shape
    assert h % 2 == 0 and w % 2 == 0
    ho, wo = h // 2, w // 2
    hp, wp = ho + 1, wo + 1
    r_pad = _round_up(hp * wp + 1, 8)
    xp = jnp.pad(x_nhwc, ((0, 0), (1, 1), (1, 1), (0, 0)))
    xs = _space_to_depth2(xp).reshape(n, hp * wp, 4 * c)
    xs = jnp.pad(xs, ((0, 0), (0, r_pad - hp * wp), (0, 0)))
    return xs.astype(jnp.bfloat16), ho, wo


# ----------------------------------------------------------------------------
# Kernels
# ----------------------------------------------------------------------------
def _conv_core(x_ref, w_ref, b_ref, m_ref, *, nb, r_pad, wp, ho, wo,
               apply_in, eps, slope):
    """Conv(4x4,s2,p1) + bias + LeakyReLU [+ InstanceNorm + LeakyReLU] for Nb samples.

    Returns (y, maskf): y is (nb, ho*wp, cout) f32 with a junk column at ox == wo;
    maskf is (ho*wp, 1) f32 (1.0 on valid pixels, 0.0 on the junk column).
    """
    k = w_ref.shape[1]
    cout = w_ref.shape[2]
    howp = ho * wp
    x = x_ref[...].reshape(nb * r_pad, k)                     # bf16, M = nb * r_pad
    acc = jnp.zeros((nb, howp, cout), jnp.float32)
    for a in range(2):
        for b in range(2):
            y_t = jnp.dot(x, w_ref[2 * a + b],                # one big MXU dot per tap
                          preferred_element_type=jnp.float32)
            y_t = y_t.reshape(nb, r_pad, cout)
            off = a * wp + b                                  # shifted slice-add
            acc = acc + y_t[:, off:off + howp, :]
    maskf = m_ref[...]                                        # (howp, 1) f32
    y = acc + b_ref[...]
    y = jnp.where(y >= 0, y, slope * y)                       # leaky after conv
    if apply_in:                                              # InstanceNorm2d, affine=False
        inv_cnt = 1.0 / float(ho * wo)
        mu = jnp.sum(y * maskf, axis=1, keepdims=True) * inv_cnt
        d = y - mu
        var = jnp.sum((d * d) * maskf, axis=1, keepdims=True) * inv_cnt
        y = d * lax.rsqrt(var + eps)
        y = jnp.where(y >= 0, y, slope * y)                   # leaky after IN
    return y, maskf


def _conv_stage_kernel(x_ref, w_ref, b_ref, m_ref, o_ref, *, nb, r_pad, wp, ho, wo,
                       apply_in, eps, slope):
    y, maskf = _conv_core(x_ref, w_ref, b_ref, m_ref, nb=nb, r_pad=r_pad, wp=wp,
                          ho=ho, wo=wo, apply_in=apply_in, eps=eps, slope=slope)
    o_ref[...] = (y * maskf).astype(o_ref.dtype)              # junk column zeroed


def _conv_pool_head_kernel(x_ref, w_ref, b_ref, m_ref, wd_ref, bd_ref, o_ref, *,
                           nb, r_pad, wp, ho, wo, apply_in, eps, slope):
    y, maskf = _conv_core(x_ref, w_ref, b_ref, m_ref, nb=nb, r_pad=r_pad, wp=wp,
                          ho=ho, wo=wo, apply_in=apply_in, eps=eps, slope=slope)
    inv_cnt = 1.0 / float(ho * wo)
    h = jnp.sum(y * maskf, axis=1) * inv_cnt                  # global avg pool, (nb, cout) f32
    logits = jnp.dot(h, wd_ref[...],
                     preferred_element_type=jnp.float32) + bd_ref[...]
    o_ref[...] = logits.reshape(nb, 1, logits.shape[-1])      # lane-dense f32 store


# ----------------------------------------------------------------------------
# Stage wrapper
# ----------------------------------------------------------------------------
def _pick_batch_block(n, per_sample_bytes, budget_bytes=6 << 20, cap=16):
    """Largest divisor of n under the VMEM budget that keeps >= 2 grid steps."""
    if n <= 1:
        return 1
    limit = max(1, min(cap, n // 2, budget_bytes // max(per_sample_bytes, 1)))
    for nb in range(int(limit), 0, -1):
        if n % nb == 0:
            return nb
    return 1


def conv_stage(x_nhwc, w_packed, bias, *, apply_in, head=None,
               eps=1e-6, slope=0.2, out_dtype=jnp.bfloat16):
    """One fused encoder stage.

    head=None     : Conv(4,s2,p1)+LeakyReLU[+IN+LeakyReLU]       -> (n, ho, wo, cout) bf16
    head=(wd, bd) : ... + global avg pool + both Dense heads     -> (n, n_pad) f32 logits
    """
    n = x_nhwc.shape[0]
    xs, ho, wo = _to_phase(x_nhwc)
    _, r_pad, k = xs.shape
    wp = wo + 1
    howp = ho * wp
    cout = w_packed.shape[-1]
    pool = head is not None

    # valid-pixel mask (excludes the junk column ox == wo of the padded accumulator)
    maskf = jnp.asarray(
        (np.arange(howp) % wp < wo).astype(np.float32).reshape(howp, 1))

    out_bytes = (head[0].shape[1] * 4) if pool else (howp * cout * 2)
    per_sample = 2 * (r_pad * k * 2) + 2 * out_bytes + (r_pad + 2 * howp) * cout * 4
    nb = _pick_batch_block(n, per_sample)
    grid = (n // nb,)
    cparams = pltpu.CompilerParams(
        dimension_semantics=("parallel",),
        vmem_limit_bytes=32 * 1024 * 1024)      # explicit: v5e scoped default is 16 MiB

    common_specs = [
        pl.BlockSpec((nb, r_pad, k), lambda i: (i, 0, 0)),
        pl.BlockSpec((4, k, cout), lambda i: (0, 0, 0)),      # resident weights
        pl.BlockSpec((1, cout), lambda i: (0, 0)),            # resident bias
        pl.BlockSpec((howp, 1), lambda i: (0, 0)),            # resident mask
    ]
    kw = dict(nb=nb, r_pad=r_pad, wp=wp, ho=ho, wo=wo,
              apply_in=apply_in, eps=eps, slope=slope)

    if not pool:
        out = pl.pallas_call(
            functools.partial(_conv_stage_kernel, **kw),
            out_shape=jax.ShapeDtypeStruct((n, howp, cout), out_dtype),
            grid_spec=pltpu.PrefetchScalarGridSpec(
                num_scalar_prefetch=0, grid=grid,
                in_specs=common_specs,
                out_specs=pl.BlockSpec((nb, howp, cout), lambda i: (i, 0, 0))),
            compiler_params=cparams,
        )(xs, w_packed, bias, maskf)
        # relabel + drop of the (already zeroed) junk column; fuses into next-stage glue
        return out.reshape(n, ho, wp, cout)[:, :, :wo, :]

    wd, bd = head
    n_out = wd.shape[1]
    out = pl.pallas_call(
        functools.partial(_conv_pool_head_kernel, **kw),
        out_shape=jax.ShapeDtypeStruct((n, 1, n_out), jnp.float32),
        grid_spec=pltpu.PrefetchScalarGridSpec(
            num_scalar_prefetch=0, grid=grid,
            in_specs=common_specs + [
                pl.BlockSpec(wd.shape, lambda i: (0, 0)),     # resident packed heads
                pl.BlockSpec((1, n_out), lambda i: (0, 0)),
            ],
            out_specs=pl.BlockSpec((nb, 1, n_out), lambda i: (i, 0, 0))),
        compiler_params=cparams,
    )(xs, w_packed, bias, maskf, wd, bd)
    return out.reshape(n, n_out)


# ----------------------------------------------------------------------------
# Posterior forward (Encoder + fused dense1/dense2 heads)
# ----------------------------------------------------------------------------
def posterior_forward(inputs, prepared, *, nz):
    """inputs: (T, B, C, H, W) float32 frames (NCHW per frame, like PyTorch)."""
    tt, bb, cc, hh, ww = inputs.shape
    # torch.cat([inputs[:-1], inputs[1:]], dim=-3) -> (T-1, B, 2C, H, W)
    x = jnp.concatenate([inputs[:-1], inputs[1:]], axis=-3)
    x = x.reshape(-1, 2 * cc, hh, ww)
    x = jnp.transpose(x, (0, 2, 3, 1))            # single NCHW->NHWC boundary transpose

    convs = prepared["convs"]
    n_layers = len(convs)
    logits = None
    for li, (wc, bc) in enumerate(convs):
        if li == n_layers - 1:                    # last stage: + pool + both dense heads
            logits = conv_stage(x, wc, bc, apply_in=(li > 0),
                                head=(prepared["head_w"], prepared["head_b"]))
        else:
            x = conv_stage(x, wc, bc, apply_in=(li > 0))

    z_mu = logits[:, :nz].reshape(tt - 1, bb, nz)
    z_lss = jnp.clip(logits[:, nz:2 * nz], -10.0, 10.0).reshape(tt - 1, bb, nz)
    return {"zs_mu": z_mu, "zs_log_sigma_sq": z_lss}


# ----------------------------------------------------------------------------
# Pure-JAX f32 reference (exact PyTorch op ordering: leaky after conv AND after IN)
# ----------------------------------------------------------------------------
def _reference_posterior(inputs, params):
    tt, bb, cc, hh, ww = inputs.shape
    x = jnp.concatenate([inputs[:-1], inputs[1:]], axis=-3).reshape(-1, 2 * cc, hh, ww)
    for li, (wc, bc) in enumerate(params["convs"]):
        x = lax.conv_general_dilated(
            x, wc, window_strides=(2, 2), padding=((1, 1), (1, 1)),
            dimension_numbers=("NCHW", "OIHW", "NCHW"))
        x = x + bc[None, :, None, None]
        x = jnp.where(x >= 0, x, 0.2 * x)
        if li > 0:
            mu = jnp.mean(x, axis=(2, 3), keepdims=True)
            var = jnp.mean(jnp.square(x - mu), axis=(2, 3), keepdims=True)
            x = (x - mu) * lax.rsqrt(var + 1e-6)
            x = jnp.where(x >= 0, x, 0.2 * x)
    h = jnp.mean(x, axis=(2, 3))
    w1, b1 = params["dense1"]
    w2, b2 = params["dense2"]
    z_mu = (h @ w1 + b1).reshape(tt - 1, bb, -1)
    z_lss = jnp.clip(h @ w2 + b2, -10.0, 10.0).reshape(tt - 1, bb, -1)
    return {"zs_mu": z_mu, "zs_log_sigma_sq": z_lss}


if __name__ == "__main__":
    key = jax.random.PRNGKey(0)

    # small shapes consistent with the module: inputs (T, B, C, H, W)
    T, B, C, H, W = 3, 2, 4, 16, 16
    nef, n_layers, nz = 32, 3, 8          # hparams.nef / n_layers / nz ; use_e_rnn=False

    # encoder channels: conv0 (2C -> nef), then nef*min(2**i, 4) for i = 1 .. n_layers-1
    chans = [2 * C, nef] + [nef * min(2 ** i, 4) for i in range(1, n_layers)]

    keys = jax.random.split(key, 2 * n_layers + 3)
    ki = 0
    convs = []
    for li in range(n_layers):
        cin, cout = chans[li], chans[li + 1]
        wc = 0.05 * jax.random.normal(keys[ki], (cout, cin, 4, 4), jnp.float32); ki += 1
        bc = 0.05 * jax.random.normal(keys[ki], (cout,), jnp.float32);           ki += 1
        convs.append((wc, bc))

    c_final = nef * min(4, 2 ** (n_layers - 1))       # Dense in_channels
    w1 = 0.02 * jax.random.normal(keys[ki], (c_final, nz), jnp.float32); ki += 1
    w2 = 0.02 * jax.random.normal(keys[ki], (c_final, nz), jnp.float32); ki += 1
    b1 = jnp.zeros((nz,), jnp.float32)
    b2 = jnp.zeros((nz,), jnp.float32)

    x = jax.random.normal(keys[-1], (T, B, C, H, W), jnp.float32)
    params = {"convs": convs, "dense1": (w1, b1), "dense2": (w2, b2)}

    prepared = prepare_params(params)          # one-time weight repack / head packing
    fwd = jax.jit(functools.partial(posterior_forward, nz=nz))
    outs = fwd(x, prepared)
    jax.block_until_ready(outs)

    assert outs["zs_mu"].shape == (T - 1, B, nz)
    assert outs["zs_log_sigma_sq"].shape == (T - 1, B, nz)

    ref = _reference_posterior(x, params)
    err = max(float(jnp.max(jnp.abs(outs["zs_mu"] - ref["zs_mu"]))),
              float(jnp.max(jnp.abs(outs["zs_log_sigma_sq"] - ref["zs_log_sigma_sq"]))))
    assert err < 3e-2, f"mismatch vs pure-JAX reference: max|diff| = {err}"

    print("KERNEL_OK")
</pallas_src>

<mosaic_0001>
module attributes {stable_mosaic.version = 11 : i64} {
  func.func @_conv_stage_kernel(%arg0: i32, %arg1: memref<2x88x32xbf16, #tpu.memory_space<vmem>>, %arg2: memref<4x32x32xbf16, #tpu.memory_space<vmem>>, %arg3: memref<1x32xf32, #tpu.memory_space<vmem>>, %arg4: memref<72x1xf32, #tpu.memory_space<vmem>>, %arg5: memref<2x72x32xbf16, #tpu.memory_space<vmem>>) attributes {dimension_semantics = [#tpu.dimension_semantics<parallel>], iteration_bounds = array<i64: 2>, scalar_prefetch = 0 : i64, scratch_operands = 0 : i64, tpu.core_type = #tpu.core_type<tc>, window_params = [{transform_indices = @transform_0, window_bounds = array<i64: 2, 88, 32>}, {pipeline_mode = #tpu.pipeline_mode<synchronous>, transform_indices = @transform_1, window_bounds = array<i64: 4, 32, 32>}, {pipeline_mode = #tpu.pipeline_mode<synchronous>, transform_indices = @transform_2, window_bounds = array<i64: 1, 32>}, {pipeline_mode = #tpu.pipeline_mode<synchronous>, transform_indices = @transform_3, window_bounds = array<i64: 72, 1>}, {transform_indices = @transform_4, window_bounds = array<i64: 2, 72, 32>}]} {
    %c0 = arith.constant 0 : index
    %c0_0 = arith.constant 0 : index
    %c0_1 = arith.constant 0 : index
    %0 = vector.load %arg1[%c0, %c0_0, %c0_1] : memref<2x88x32xbf16, #tpu.memory_space<vmem>>, vector<2x88x32xbf16>
    %1 = vector.shape_cast %0 : vector<2x88x32xbf16> to vector<176x32xbf16>
    %cst = arith.constant 0.000000e+00 : f32
    %2 = vector.broadcast %cst : f32 to vector<2x72x32xf32>
    %c0_2 = arith.constant 0 : index
    %c0_3 = arith.constant 0 : index
    %c0_4 = arith.constant 0 : index
    %3 = vector.load %arg2[%c0_2, %c0_3, %c0_4] : memref<4x32x32xbf16, #tpu.memory_space<vmem>>, vector<1x32x32xbf16>
    %4 = vector.shape_cast %3 : vector<1x32x32xbf16> to vector<32x32xbf16>
    %cst_5 = arith.constant dense<0.000000e+00> : vector<176x32xf32>
    %5 = tpu.matmul %1, %4, %cst_5 {dimension_numbers = #tpu.dot_dimension_numbers<[1], [0], [0], [1], [0, 0, 1, 1], [], []>} : vector<176x32xbf16>, vector<32x32xbf16>, vector<176x32xf32> -> vector<176x32xf32>
    %6 = vector.shape_cast %5 : vector<176x32xf32> to vector<2x88x32xf32>
    %7 = vector.extract_strided_slice %6 {offsets = [0, 0, 0], sizes = [2, 72, 32], strides = [1, 1, 1]} : vector<2x88x32xf32> to vector<2x72x32xf32>
    %8 = arith.addf %2, %7 : vector<2x72x32xf32>
    %c1 = arith.constant 1 : index
    %c0_6 = arith.constant 0 : index
    %c0_7 = arith.constant 0 : index
    %9 = vector.load %arg2[%c1, %c0_6, %c0_7] : memref<4x32x32xbf16, #tpu.memory_space<vmem>>, vector<1x32x32xbf16>
    %10 = vector.shape_cast %9 : vector<1x32x32xbf16> to vector<32x32xbf16>
    %cst_8 = arith.constant dense<0.000000e+00> : vector<176x32xf32>
    %11 = tpu.matmul %1, %10, %cst_8 {dimension_numbers = #tpu.dot_dimension_numbers<[1], [0], [0], [1], [0, 0, 1, 1], [], []>} : vector<176x32xbf16>, vector<32x32xbf16>, vector<176x32xf32> -> vector<176x32xf32>
    %12 = vector.shape_cast %11 : vector<176x32xf32> to vector<2x88x32xf32>
    %13 = vector.extract_strided_slice %12 {offsets = [0, 1, 0], sizes = [2, 72, 32], strides = [1, 1, 1]} : vector<2x88x32xf32> to vector<2x72x32xf32>
    %14 = arith.addf %8, %13 : vector<2x72x32xf32>
    %c2 = arith.constant 2 : index
    %c0_9 = arith.constant 0 : index
    %c0_10 = arith.constant 0 : index
    %15 = vector.load %arg2[%c2, %c0_9, %c0_10] : memref<4x32x32xbf16, #tpu.memory_space<vmem>>, vector<1x32x32xbf16>
    %16 = vector.shape_cast %15 : vector<1x32x32xbf16> to vector<32x32xbf16>
    %cst_11 = arith.constant dense<0.000000e+00> : vector<176x32xf32>
    %17 = tpu.matmul %1, %16, %cst_11 {dimension_numbers = #tpu.dot_dimension_numbers<[1], [0], [0], [1], [0, 0, 1, 1], [], []>} : vector<176x32xbf16>, vector<32x32xbf16>, vector<176x32xf32> -> vector<176x32xf32>
    %18 = vector.shape_cast %17 : vector<176x32xf32> to vector<2x88x32xf32>
    %19 = vector.extract_strided_slice %18 {offsets = [0, 9, 0], sizes = [2, 72, 32], strides = [1, 1, 1]} : vector<2x88x32xf32> to vector<2x72x32xf32>
    %20 = arith.addf %14, %19 : vector<2x72x32xf32>
    %c3 = arith.constant 3 : index
    %c0_12 = arith.constant 0 : index
    %c0_13 = arith.constant 0 : index
    %21 = vector.load %arg2[%c3, %c0_12, %c0_13] : memref<4x32x32xbf16, #tpu.memory_space<vmem>>, vector<1x32x32xbf16>
    %22 = vector.shape_cast %21 : vector<1x32x32xbf16> to vector<32x32xbf16>
    %cst_14 = arith.constant dense<0.000000e+00> : vector<176x32xf32>
    %23 = tpu.matmul %1, %22, %cst_14 {dimension_numbers = #tpu.dot_dimension_numbers<[1], [0], [0], [1], [0, 0, 1, 1], [], []>} : vector<176x32xbf16>, vector<32x32xbf16>, vector<176x32xf32> -> vector<176x32xf32>
    %24 = vector.shape_cast %23 : vector<176x32xf32> to vector<2x88x32xf32>
    %25 = vector.extract_strided_slice %24 {offsets = [0, 10, 0], sizes = [2, 72, 32], strides = [1, 1, 1]} : vector<2x88x32xf32> to vector<2x72x32xf32>
    %26 = arith.addf %20, %25 : vector<2x72x32xf32>
    %c0_15 = arith.constant 0 : index
    %c0_16 = arith.constant 0 : index
    %27 = vector.load %arg4[%c0_15, %c0_16] : memref<72x1xf32, #tpu.memory_space<vmem>>, vector<72x1xf32>
    %c0_17 = arith.constant 0 : index
    %c0_18 = arith.constant 0 : index
    %28 = vector.load %arg3[%c0_17, %c0_18] : memref<1x32xf32, #tpu.memory_space<vmem>>, vector<1x32xf32>
    %29 = vector.shape_cast %28 : vector<1x32xf32> to vector<1x1x32xf32>
    %30 = vector.broadcast %29 : vector<1x1x32xf32> to vector<2x72x32xf32>
    %31 = arith.addf %26, %30 : vector<2x72x32xf32>
    %cst_19 = arith.constant 0.000000e+00 : f32
    %32 = vector.broadcast %cst_19 : f32 to vector<2x72x32xf32>
    %33 = arith.cmpf oge, %31, %32 : vector<2x72x32xf32>
    %cst_20 = arith.constant 2.000000e-01 : f32
    %34 = vector.broadcast %cst_20 : f32 to vector<2x72x32xf32>
    %35 = arith.mulf %34, %31 : vector<2x72x32xf32>
    %36 = arith.select %33, %31, %35 : vector<2x72x32xi1>, vector<2x72x32xf32>
    %37 = vector.shape_cast %27 : vector<72x1xf32> to vector<1x72x1xf32>
    %38 = vector.broadcast %37 : vector<1x72x1xf32> to vector<2x72x32xf32>
    %39 = arith.mulf %36, %38 : vector<2x72x32xf32>
    %40 = arith.truncf %39 : vector<2x72x32xf32> to vector<2x72x32xbf16>
    %c0_21 = arith.constant 0 : index
    %c0_22 = arith.constant 0 : index
    %c0_23 = arith.constant 0 : index
    %41 = vector.load %arg5[%c0_21, %c0_22, %c0_23] : memref<2x72x32xbf16, #tpu.memory_space<vmem>>, vector<2x72x32xbf16>
    tpu.vector_store %arg5[%c0_21, %c0_22, %c0_23], %40 {strides = array<i32>} : memref<2x72x32xbf16, #tpu.memory_space<vmem>>, vector<2x72x32xbf16>,
    return
  }
  func.func @transform_0(%arg0: i32) -> (i32, i32, i32) {
    %c0_i32 = arith.constant 0 : i32
    %c0_i32_0 = arith.constant 0 : i32
    %c0_i32_1 = arith.constant 0 : i32
    return %arg0, %c0_i32, %c0_i32_0 : i32, i32, i32
  }
  func.func @transform_1(%arg0: i32) -> (i32, i32, i32) {
    %c0_i32 = arith.constant 0 : i32
    %c0_i32_0 = arith.constant 0 : i32
    %c0_i32_1 = arith.constant 0 : i32
    %c0_i32_2 = arith.constant 0 : i32
    return %c0_i32, %c0_i32_0, %c0_i32_1 : i32, i32, i32
  }
  func.func @transform_2(%arg0: i32) -> (i32, i32) {
    %c0_i32 = arith.constant 0 : i32
    %c0_i32_0 = arith.constant 0 : i32
    %c0_i32_1 = arith.constant 0 : i32
    return %c0_i32, %c0_i32_0 : i32, i32
  }
  func.func @transform_3(%arg0: i32) -> (i32, i32) {
    %c0_i32 = arith.constant 0 : i32
    %c0_i32_0 = arith.constant 0 : i32
    %c0_i32_1 = arith.constant 0 : i32
    return %c0_i32, %c0_i32_0 : i32, i32
  }
  func.func @transform_4(%arg0: i32) -> (i32, i32, i32) {
    %c0_i32 = arith.constant 0 : i32
    %c0_i32_0 = arith.constant 0 : i32
    %c0_i32_1 = arith.constant 0 : i32
    return %arg0, %c0_i32, %c0_i32_0 : i32, i32, i32
  }
}

module attributes {stable_mosaic.version = 11 : i64} {
  func.func @_conv_stage_kernel(%arg0: i32, %arg1: memref<2x32x128xbf16, #tpu.memory_space<vmem>>, %arg2: memref<4x128x64xbf16, #tpu.memory_space<vmem>>, %arg3: memref<1x64xf32, #tpu.memory_space<vmem>>, %arg4: memref<20x1xf32, #tpu.memory_space<vmem>>, %arg5: memref<2x20x64xbf16, #tpu.memory_space<vmem>>) attributes {dimension_semantics = [#tpu.dimension_semantics<parallel>], iteration_bounds = array<i64: 2>, scalar_prefetch = 0 : i64, scratch_operands = 0 : i64, tpu.core_type = #tpu.core_type<tc>, window_params = [{transform_indices = @transform_0, window_bounds = array<i64: 2, 32, 128>}, {pipeline_mode = #tpu.pipeline_mode<synchronous>, transform_indices = @transform_1, window_bounds = array<i64: 4, 128, 64>}, {pipeline_mode = #tpu.pipeline_mode<synchronous>, transform_indices = @transform_2, window_bounds = array<i64: 1, 64>}, {pipeline_mode = #tpu.pipeline_mode<synchronous>, transform_indices = @transform_3, window_bounds = array<i64: 20, 1>}, {transform_indices = @transform_4, window_bounds = array<i64: 2, 20, 64>}]} {
    %c0 = arith.constant 0 : index
    %c0_0 = arith.constant 0 : index
    %c0_1 = arith.constant 0 : index
    %0 = vector.load %arg1[%c0, %c0_0, %c0_1] : memref<2x32x128xbf16, #tpu.memory_space<vmem>>, vector<2x32x128xbf16>
    %1 = vector.shape_cast %0 : vector<2x32x128xbf16> to vector<64x128xbf16>
    %cst = arith.constant 0.000000e+00 : f32
    %2 = vector.broadcast %cst : f32 to vector<2x20x64xf32>
    %c0_2 = arith.constant 0 : index
    %c0_3 = arith.constant 0 : index
    %c0_4 = arith.constant 0 : index
    %3 = vector.load %arg2[%c0_2, %c0_3, %c0_4] : memref<4x128x64xbf16, #tpu.memory_space<vmem>>, vector<1x128x64xbf16>
    %4 = vector.shape_cast %3 : vector<1x128x64xbf16> to vector<128x64xbf16>
    %cst_5 = arith.constant dense<0.000000e+00> : vector<64x64xf32>
    %5 = tpu.matmul %1, %4, %cst_5 {dimension_numbers = #tpu.dot_dimension_numbers<[1], [0], [0], [1], [0, 0, 1, 1], [], []>} : vector<64x128xbf16>, vector<128x64xbf16>, vector<64x64xf32> -> vector<64x64xf32>
    %6 = vector.shape_cast %5 : vector<64x64xf32> to vector<2x32x64xf32>
    %7 = vector.extract_strided_slice %6 {offsets = [0, 0, 0], sizes = [2, 20, 64], strides = [1, 1, 1]} : vector<2x32x64xf32> to vector<2x20x64xf32>
    %8 = arith.addf %2, %7 : vector<2x20x64xf32>
    %c1 = arith.constant 1 : index
    %c0_6 = arith.constant 0 : index
    %c0_7 = arith.constant 0 : index
    %9 = vector.load %arg2[%c1, %c0_6, %c0_7] : memref<4x128x64xbf16, #tpu.memory_space<vmem>>, vector<1x128x64xbf16>
    %10 = vector.shape_cast %9 : vector<1x128x64xbf16> to vector<128x64xbf16>
    %cst_8 = arith.constant dense<0.000000e+00> : vector<64x64xf32>
    %11 = tpu.matmul %1, %10, %cst_8 {dimension_numbers = #tpu.dot_dimension_numbers<[1], [0], [0], [1], [0, 0, 1, 1], [], []>} : vector<64x128xbf16>, vector<128x64xbf16>, vector<64x64xf32> -> vector<64x64xf32>
    %12 = vector.shape_cast %11 : vector<64x64xf32> to vector<2x32x64xf32>
    %13 = vector.extract_strided_slice %12 {offsets = [0, 1, 0], sizes = [2, 20, 64], strides = [1, 1, 1]} : vector<2x32x64xf32> to vector<2x20x64xf32>
    %14 = arith.addf %8, %13 : vector<2x20x64xf32>
    %c2 = arith.constant 2 : index
    %c0_9 = arith.constant 0 : index
    %c0_10 = arith.constant 0 : index
    %15 = vector.load %arg2[%c2, %c0_9, %c0_10] : memref<4x128x64xbf16, #tpu.memory_space<vmem>>, vector<1x128x64xbf16>
    %16 = vector.shape_cast %15 : vector<1x128x64xbf16> to vector<128x64xbf16>
    %cst_11 = arith.constant dense<0.000000e+00> : vector<64x64xf32>
    %17 = tpu.matmul %1, %16, %cst_11 {dimension_numbers = #tpu.dot_dimension_numbers<[1], [0], [0], [1], [0, 0, 1, 1], [], []>} : vector<64x128xbf16>, vector<128x64xbf16>, vector<64x64xf32> -> vector<64x64xf32>
    %18 = vector.shape_cast %17 : vector<64x64xf32> to vector<2x32x64xf32>
    %19 = vector.extract_strided_slice %18 {offsets = [0, 5, 0], sizes = [2, 20, 64], strides = [1, 1, 1]} : vector<2x32x64xf32> to vector<2x20x64xf32>
    %20 = arith.addf %14, %19 : vector<2x20x64xf32>
    %c3 = arith.constant 3 : index
    %c0_12 = arith.constant 0 : index
    %c0_13 = arith.constant 0 : index
    %21 = vector.load %arg2[%c3, %c0_12, %c0_13] : memref<4x128x64xbf16, #tpu.memory_space<vmem>>, vector<1x128x64xbf16>
    %22 = vector.shape_cast %21 : vector<1x128x64xbf16> to vector<128x64xbf16>
    %cst_14 = arith.constant dense<0.000000e+00> : vector<64x64xf32>
    %23 = tpu.matmul %1, %22, %cst_14 {dimension_numbers = #tpu.dot_dimension_numbers<[1], [0], [0], [1], [0, 0, 1, 1], [], []>} : vector<64x128xbf16>, vector<128x64xbf16>, vector<64x64xf32> -> vector<64x64xf32>
    %24 = vector.shape_cast %23 : vector<64x64xf32> to vector<2x32x64xf32>
    %25 = vector.extract_strided_slice %24 {offsets = [0, 6, 0], sizes = [2, 20, 64], strides = [1, 1, 1]} : vector<2x32x64xf32> to vector<2x20x64xf32>
    %26 = arith.addf %20, %25 : vector<2x20x64xf32>
    %c0_15 = arith.constant 0 : index
    %c0_16 = arith.constant 0 : index
    %27 = vector.load %arg4[%c0_15, %c0_16] : memref<20x1xf32, #tpu.memory_space<vmem>>, vector<20x1xf32>
    %c0_17 = arith.constant 0 : index
    %c0_18 = arith.constant 0 : index
    %28 = vector.load %arg3[%c0_17, %c0_18] : memref<1x64xf32, #tpu.memory_space<vmem>>, vector<1x64xf32>
    %29 = vector.shape_cast %28 : vector<1x64xf32> to vector<1x1x64xf32>
    %30 = vector.broadcast %29 : vector<1x1x64xf32> to vector<2x20x64xf32>
    %31 = arith.addf %26, %30 : vector<2x20x64xf32>
    %cst_19 = arith.constant 0.000000e+00 : f32
    %32 = vector.broadcast %cst_19 : f32 to vector<2x20x64xf32>
    %33 = arith.cmpf oge, %31, %32 : vector<2x20x64xf32>
    %cst_20 = arith.constant 2.000000e-01 : f32
    %34 = vector.broadcast %cst_20 : f32 to vector<2x20x64xf32>
    %35 = arith.mulf %34, %31 : vector<2x20x64xf32>
    %36 = arith.select %33, %31, %35 : vector<2x20x64xi1>, vector<2x20x64xf32>
    %37 = vector.shape_cast %27 : vector<20x1xf32> to vector<1x20x1xf32>
    %38 = vector.broadcast %37 : vector<1x20x1xf32> to vector<2x20x64xf32>
    %39 = arith.mulf %36, %38 : vector<2x20x64xf32>
    %cst_21 = arith.constant dense<0.000000e+00> : vector<2x64xf32>
    %40 = vector.multi_reduction <add>, %39, %cst_21 [1] : vector<2x20x64xf32> to vector<2x64xf32>
    %41 = vector.shape_cast %40 : vector<2x64xf32> to vector<2x1x64xf32>
    %cst_22 = arith.constant 6.250000e-02 : f32
    %42 = vector.broadcast %cst_22 : f32 to vector<2x1x64xf32>
    %43 = arith.mulf %41, %42 : vector<2x1x64xf32>
    %44 = vector.broadcast %43 : vector<2x1x64xf32> to vector<2x20x64xf32>
    %45 = arith.subf %36, %44 : vector<2x20x64xf32>
    %46 = arith.mulf %45, %45 : vector<2x20x64xf32>
    %47 = vector.shape_cast %27 : vector<20x1xf32> to vector<1x20x1xf32>
    %48 = vector.broadcast %47 : vector<1x20x1xf32> to vector<2x20x64xf32>
    %49 = arith.mulf %46, %48 : vector<2x20x64xf32>
    %cst_23 = arith.constant dense<0.000000e+00> : vector<2x64xf32>
    %50 = vector.multi_reduction <add>, %49, %cst_23 [1] : vector<2x20x64xf32> to vector<2x64xf32>
    %51 = vector.shape_cast %50 : vector<2x64xf32> to vector<2x1x64xf32>
    %cst_24 = arith.constant 6.250000e-02 : f32
    %52 = vector.broadcast %cst_24 : f32 to vector<2x1x64xf32>
    %53 = arith.mulf %51, %52 : vector<2x1x64xf32>
    %cst_25 = arith.constant 9.99999997E-7 : f32
    %54 = vector.broadcast %cst_25 : f32 to vector<2x1x64xf32>
    %55 = arith.addf %53, %54 : vector<2x1x64xf32>
    %56 = math.rsqrt %55 : vector<2x1x64xf32>
    %57 = vector.broadcast %56 : vector<2x1x64xf32> to vector<2x20x64xf32>
    %58 = arith.mulf %45, %57 : vector<2x20x64xf32>
    %cst_26 = arith.constant 0.000000e+00 : f32
    %59 = vector.broadcast %cst_26 : f32 to vector<2x20x64xf32>
    %60 = arith.cmpf oge, %58, %59 : vector<2x20x64xf32>
    %cst_27 = arith.constant 2.000000e-01 : f32
    %61 = vector.broadcast %cst_27 : f32 to vector<2x20x64xf32>
    %62 = arith.mulf %61, %58 : vector<2x20x64xf32>
    %63 = arith.select %60, %58, %62 : vector<2x20x64xi1>, vector<2x20x64xf32>
    %64 = vector.shape_cast %27 : vector<20x1xf32> to vector<1x20x1xf32>
    %65 = vector.broadcast %64 : vector<1x20x1xf32> to vector<2x20x64xf32>
    %66 = arith.mulf %63, %65 : vector<2x20x64xf32>
    %67 = arith.truncf %66 : vector<2x20x64xf32> to vector<2x20x64xbf16>
    %c0_28 = arith.constant 0 : index
    %c0_29 = arith.constant 0 : index
    %c0_30 = arith.constant 0 : index
    %68 = vector.load %arg5[%c0_28, %c0_29, %c0_30] : memref<2x20x64xbf16, #tpu.memory_space<vmem>>, vector<2x20x64xbf16>
    tpu.vector_store %arg5[%c0_28, %c0_29, %c0_30], %67 {strides = array<i32>} : memref<2x20x64xbf16, #tpu.memory_space<vmem>>, vector<2x20x64xbf16>,
    return
  }
  func.func @transform_0(%arg0: i32) -> (i32, i32, i32) {
    %c0_i32 = arith.constant 0 : i32
    %c0_i32_0 = arith.constant 0 : i32
    %c0_i32_1 = arith.constant 0 : i32
    return %arg0, %c0_i32, %c0_i32_0 : i32, i32, i32
  }
  func.func @transform_1(%arg0: i32) -> (i32, i32, i32) {
    %c0_i32 = arith.constant 0 : i32
    %c0_i32_0 = arith.constant 0 : i32
    %c0_i32_1 = arith.constant 0 : i32
    %c0_i32_2 = arith.constant 0 : i32
    return %c0_i32, %c0_i32_0, %c0_i32_1 : i32, i32, i32
  }
  func.func @transform_2(%arg0: i32) -> (i32, i32) {
    %c0_i32 = arith.constant 0 : i32
    %c0_i32_0 = arith.constant 0 : i32
    %c0_i32_1 = arith.constant 0 : i32
    return %c0_i32, %c0_i32_0 : i32, i32
  }
  func.func @transform_3(%arg0: i32) -> (i32, i32) {
    %c0_i32 = arith.constant 0 : i32
    %c0_i32_0 = arith.constant 0 : i32
    %c0_i32_1 = arith.constant 0 : i32
    return %c0_i32, %c0_i32_0 : i32, i32
  }
  func.func @transform_4(%arg0: i32) -> (i32, i32, i32) {
    %c0_i32 = arith.constant 0 : i32
    %c0_i32_0 = arith.constant 0 : i32
    %c0_i32_1 = arith.constant 0 : i32
    return %arg0, %c0_i32, %c0_i32_0 : i32, i32, i32
  }
}

module attributes {stable_mosaic.version = 11 : i64} {
  func.func @_conv_pool_head_kernel(%arg0: i32, %arg1: memref<2x16x256xbf16, #tpu.memory_space<vmem>>, %arg2: memref<4x256x128xbf16, #tpu.memory_space<vmem>>, %arg3: memref<1x128xf32, #tpu.memory_space<vmem>>, %arg4: memref<6x1xf32, #tpu.memory_space<vmem>>, %arg5: memref<128x128xf32, #tpu.memory_space<vmem>>, %arg6: memref<1x128xf32, #tpu.memory_space<vmem>>, %arg7: memref<2x1x128xf32, #tpu.memory_space<vmem>>) attributes {dimension_semantics = [#tpu.dimension_semantics<parallel>], iteration_bounds = array<i64: 2>, scalar_prefetch = 0 : i64, scratch_operands = 0 : i64, tpu.core_type = #tpu.core_type<tc>, window_params = [{transform_indices = @transform_0, window_bounds = array<i64: 2, 16, 256>}, {pipeline_mode = #tpu.pipeline_mode<synchronous>, transform_indices = @transform_1, window_bounds = array<i64: 4, 256, 128>}, {pipeline_mode = #tpu.pipeline_mode<synchronous>, transform_indices = @transform_2, window_bounds = array<i64: 1, 128>}, {pipeline_mode = #tpu.pipeline_mode<synchronous>, transform_indices = @transform_3, window_bounds = array<i64: 6, 1>}, {pipeline_mode = #tpu.pipeline_mode<synchronous>, transform_indices = @transform_4, window_bounds = array<i64: 128, 128>}, {pipeline_mode = #tpu.pipeline_mode<synchronous>, transform_indices = @transform_5, window_bounds = array<i64: 1, 128>}, {transform_indices = @transform_6, window_bounds = array<i64: 2, 1, 128>}]} {
    %c0 = arith.constant 0 : index
    %c0_0 = arith.constant 0 : index
    %c0_1 = arith.constant 0 : index
    %0 = vector.load %arg1[%c0, %c0_0, %c0_1] : memref<2x16x256xbf16, #tpu.memory_space<vmem>>, vector<2x16x256xbf16>
    %1 = vector.shape_cast %0 : vector<2x16x256xbf16> to vector<32x256xbf16>
    %cst = arith.constant 0.000000e+00 : f32
    %2 = vector.broadcast %cst : f32 to vector<2x6x128xf32>
    %c0_2 = arith.constant 0 : index
    %c0_3 = arith.constant 0 : index
    %c0_4 = arith.constant 0 : index
    %3 = vector.load %arg2[%c0_2, %c0_3, %c0_4] : memref<4x256x128xbf16, #tpu.memory_space<vmem>>, vector<1x256x128xbf16>
    %4 = vector.shape_cast %3 : vector<1x256x128xbf16> to vector<256x128xbf16>
    %cst_5 = arith.constant dense<0.000000e+00> : vector<32x128xf32>
    %5 = tpu.matmul %1, %4, %cst_5 {dimension_numbers = #tpu.dot_dimension_numbers<[1], [0], [0], [1], [0, 0, 1, 1], [], []>} : vector<32x256xbf16>, vector<256x128xbf16>, vector<32x128xf32> -> vector<32x128xf32>
    %6 = vector.shape_cast %5 : vector<32x128xf32> to vector<2x16x128xf32>
    %7 = vector.extract_strided_slice %6 {offsets = [0, 0, 0], sizes = [2, 6, 128], strides = [1, 1, 1]} : vector<2x16x128xf32> to vector<2x6x128xf32>
    %8 = arith.addf %2, %7 : vector<2x6x128xf32>
    %c1 = arith.constant 1 : index
    %c0_6 = arith.constant 0 : index
    %c0_7 = arith.constant 0 : index
    %9 = vector.load %arg2[%c1, %c0_6, %c0_7] : memref<4x256x128xbf16, #tpu.memory_space<vmem>>, vector<1x256x128xbf16>
    %10 = vector.shape_cast %9 : vector<1x256x128xbf16> to vector<256x128xbf16>
    %cst_8 = arith.constant dense<0.000000e+00> : vector<32x128xf32>
    %11 = tpu.matmul %1, %10, %cst_8 {dimension_numbers = #tpu.dot_dimension_numbers<[1], [0], [0], [1], [0, 0, 1, 1], [], []>} : vector<32x256xbf16>, vector<256x128xbf16>, vector<32x128xf32> -> vector<32x128xf32>
    %12 = vector.shape_cast %11 : vector<32x128xf32> to vector<2x16x128xf32>
    %13 = vector.extract_strided_slice %12 {offsets = [0, 1, 0], sizes = [2, 6, 128], strides = [1, 1, 1]} : vector<2x16x128xf32> to vector<2x6x128xf32>
    %14 = arith.addf %8, %13 : vector<2x6x128xf32>
    %c2 = arith.constant 2 : index
    %c0_9 = arith.constant 0 : index
    %c0_10 = arith.constant 0 : index
    %15 = vector.load %arg2[%c2, %c0_9, %c0_10] : memref<4x256x128xbf16, #tpu.memory_space<vmem>>, vector<1x256x128xbf16>
    %16 = vector.shape_cast %15 : vector<1x256x128xbf16> to vector<256x128xbf16>
    %cst_11 = arith.constant dense<0.000000e+00> : vector<32x128xf32>
    %17 = tpu.matmul %1, %16, %cst_11 {dimension_numbers = #tpu.dot_dimension_numbers<[1], [0], [0], [1], [0, 0, 1, 1], [], []>} : vector<32x256xbf16>, vector<256x128xbf16>, vector<32x128xf32> -> vector<32x128xf32>
    %18 = vector.shape_cast %17 : vector<32x128xf32> to vector<2x16x128xf32>
    %19 = vector.extract_strided_slice %18 {offsets = [0, 3, 0], sizes = [2, 6, 128], strides = [1, 1, 1]} : vector<2x16x128xf32> to vector<2x6x128xf32>
    %20 = arith.addf %14, %19 : vector<2x6x128xf32>
    %c3 = arith.constant 3 : index
    %c0_12 = arith.constant 0 : index
    %c0_13 = arith.constant 0 : index
    %21 = vector.load %arg2[%c3, %c0_12, %c0_13] : memref<4x256x128xbf16, #tpu.memory_space<vmem>>, vector<1x256x128xbf16>
    %22 = vector.shape_cast %21 : vector<1x256x128xbf16> to vector<256x128xbf16>
    %cst_14 = arith.constant dense<0.000000e+00> : vector<32x128xf32>
    %23 = tpu.matmul %1, %22, %cst_14 {dimension_numbers = #tpu.dot_dimension_numbers<[1], [0], [0], [1], [0, 0, 1, 1], [], []>} : vector<32x256xbf16>, vector<256x128xbf16>, vector<32x128xf32> -> vector<32x128xf32>
    %24 = vector.shape_cast %23 : vector<32x128xf32> to vector<2x16x128xf32>
    %25 = vector.extract_strided_slice %24 {offsets = [0, 4, 0], sizes = [2, 6, 128], strides = [1, 1, 1]} : vector<2x16x128xf32> to vector<2x6x128xf32>
    %26 = arith.addf %20, %25 : vector<2x6x128xf32>
    %c0_15 = arith.constant 0 : index
    %c0_16 = arith.constant 0 : index
    %27 = vector.load %arg4[%c0_15, %c0_16] : memref<6x1xf32, #tpu.memory_space<vmem>>, vector<6x1xf32>
    %c0_17 = arith.constant 0 : index
    %c0_18 = arith.constant 0 : index
    %28 = vector.load %arg3[%c0_17, %c0_18] : memref<1x128xf32, #tpu.memory_space<vmem>>, vector<1x128xf32>
    %29 = vector.shape_cast %28 : vector<1x128xf32> to vector<1x1x128xf32>
    %30 = vector.broadcast %29 : vector<1x1x128xf32> to vector<2x6x128xf32>
    %31 = arith.addf %26, %30 : vector<2x6x128xf32>
    %cst_19 = arith.constant 0.000000e+00 : f32
    %32 = vector.broadcast %cst_19 : f32 to vector<2x6x128xf32>
    %33 = arith.cmpf oge, %31, %32 : vector<2x6x128xf32>
    %cst_20 = arith.constant 2.000000e-01 : f32
    %34 = vector.broadcast %cst_20 : f32 to vector<2x6x128xf32>
    %35 = arith.mulf %34, %31 : vector<2x6x128xf32>
    %36 = arith.select %33, %31, %35 : vector<2x6x128xi1>, vector<2x6x128xf32>
    %37 = vector.shape_cast %27 : vector<6x1xf32> to vector<1x6x1xf32>
    %38 = vector.broadcast %37 : vector<1x6x1xf32> to vector<2x6x128xf32>
    %39 = arith.mulf %36, %38 : vector<2x6x128xf32>
    %cst_21 = arith.constant dense<0.000000e+00> : vector<2x128xf32>
    %40 = vector.multi_reduction <add>, %39, %cst_21 [1] : vector<2x6x128xf32> to vector<2x128xf32>
    %41 = vector.shape_cast %40 : vector<2x128xf32> to vector<2x1x128xf32>
    %cst_22 = arith.constant 2.500000e-01 : f32
    %42 = vector.broadcast %cst_22 : f32 to vector<2x1x128xf32>
    %43 = arith.mulf %41, %42 : vector<2x1x128xf32>
    %44 = vector.broadcast %43 : vector<2x1x128xf32> to vector<2x6x128xf32>
    %45 = arith.subf %36, %44 : vector<2x6x128xf32>
    %46 = arith.mulf %45, %45 : vector<2x6x128xf32>
    %47 = vector.shape_cast %27 : vector<6x1xf32> to vector<1x6x1xf32>
    %48 = vector.broadcast %47 : vector<1x6x1xf32> to vector<2x6x128xf32>
    %49 = arith.mulf %46, %48 : vector<2x6x128xf32>
    %cst_23 = arith.constant dense<0.000000e+00> : vector<2x128xf32>
    %50 = vector.multi_reduction <add>, %49, %cst_23 [1] : vector<2x6x128xf32> to vector<2x128xf32>
    %51 = vector.shape_cast %50 : vector<2x128xf32> to vector<2x1x128xf32>
    %cst_24 = arith.constant 2.500000e-01 : f32
    %52 = vector.broadcast %cst_24 : f32 to vector<2x1x128xf32>
    %53 = arith.mulf %51, %52 : vector<2x1x128xf32>
    %cst_25 = arith.constant 9.99999997E-7 : f32
    %54 = vector.broadcast %cst_25 : f32 to vector<2x1x128xf32>
    %55 = arith.addf %53, %54 : vector<2x1x128xf32>
    %56 = math.rsqrt %55 : vector<2x1x128xf32>
    %57 = vector.broadcast %56 : vector<2x1x128xf32> to vector<2x6x128xf32>
    %58 = arith.mulf %45, %57 : vector<2x6x128xf32>
    %cst_26 = arith.constant 0.000000e+00 : f32
    %59 = vector.broadcast %cst_26 : f32 to vector<2x6x128xf32>
    %60 = arith.cmpf oge, %58, %59 : vector<2x6x128xf32>
    %cst_27 = arith.constant 2.000000e-01 : f32
    %61 = vector.broadcast %cst_27 : f32 to vector<2x6x128xf32>
    %62 = arith.mulf %61, %58 : vector<2x6x128xf32>
    %63 = arith.select %60, %58, %62 : vector<2x6x128xi1>, vector<2x6x128xf32>
    %64 = vector.shape_cast %27 : vector<6x1xf32> to vector<1x6x1xf32>
    %65 = vector.broadcast %64 : vector<1x6x1xf32> to vector<2x6x128xf32>
    %66 = arith.mulf %63, %65 : vector<2x6x128xf32>
    %cst_28 = arith.constant dense<0.000000e+00> : vector<2x128xf32>
    %67 = vector.multi_reduction <add>, %66, %cst_28 [1] : vector<2x6x128xf32> to vector<2x128xf32>
    %cst_29 = arith.constant 2.500000e-01 : f32
    %68 = vector.broadcast %cst_29 : f32 to vector<2x128xf32>
    %69 = arith.mulf %67, %68 : vector<2x128xf32>
    %c0_30 = arith.constant 0 : index
    %c0_31 = arith.constant 0 : index
    %70 = vector.load %arg5[%c0_30, %c0_31] : memref<128x128xf32, #tpu.memory_space<vmem>>, vector<128x128xf32>
    %cst_32 = arith.constant dense<0.000000e+00> : vector<2x128xf32>
    %71 = tpu.matmul %69, %70, %cst_32 {dimension_numbers = #tpu.dot_dimension_numbers<[1], [0], [0], [1], [0, 0, 1, 1], [], []>} : vector<2x128xf32>, vector<128x128xf32>, vector<2x128xf32> -> vector<2x128xf32>
    %c0_33 = arith.constant 0 : index
    %c0_34 = arith.constant 0 : index
    %72 = vector.load %arg6[%c0_33, %c0_34] : memref<1x128xf32, #tpu.memory_space<vmem>>, vector<1x128xf32>
    %73 = vector.broadcast %72 : vector<1x128xf32> to vector<2x128xf32>
    %74 = arith.addf %71, %73 : vector<2x128xf32>
    %75 = vector.shape_cast %74 : vector<2x128xf32> to vector<2x1x128xf32>
    %c0_35 = arith.constant 0 : index
    %c0_36 = arith.constant 0 : index
    %c0_37 = arith.constant 0 : index
    %76 = vector.load %arg7[%c0_35, %c0_36, %c0_37] : memref<2x1x128xf32, #tpu.memory_space<vmem>>, vector<2x1x128xf32>
    tpu.vector_store %arg7[%c0_35, %c0_36, %c0_37], %75 {strides = array<i32>} : memref<2x1x128xf32, #tpu.memory_space<vmem>>, vector<2x1x128xf32>,
    return
  }
  func.func @transform_0(%arg0: i32) -> (i32, i32, i32) {
    %c0_i32 = arith.constant 0 : i32
    %c0_i32_0 = arith.constant 0 : i32
    %c0_i32_1 = arith.constant 0 : i32
    return %arg0, %c0_i32, %c0_i32_0 : i32, i32, i32
  }
  func.func @transform_1(%arg0: i32) -> (i32, i32, i32) {
    %c0_i32 = arith.constant 0 : i32
    %c0_i32_0 = arith.constant 0 : i32
    %c0_i32_1 = arith.constant 0 : i32
    %c0_i32_2 = arith.constant 0 : i32
    return %c0_i32, %c0_i32_0, %c0_i32_1 : i32, i32, i32
  }
  func.func @transform_2(%arg0: i32) -> (i32, i32) {
    %c0_i32 = arith.constant 0 : i32
    %c0_i32_0 = arith.constant 0 : i32
    %c0_i32_1 = arith.constant 0 : i32
    return %c0_i32, %c0_i32_0 : i32, i32
  }
  func.func @transform_3(%arg0: i32) -> (i32, i32) {
    %c0_i32 = arith.constant 0 : i32
    %c0_i32_0 = arith.constant 0 : i32
    %c0_i32_1 = arith.constant 0 : i32
    return %c0_i32, %c0_i32_0 : i32, i32
  }
  func.func @transform_4(%arg0: i32) -> (i32, i32) {
    %c0_i32 = arith.constant 0 : i32
    %c0_i32_0 = arith.constant 0 : i32
    %c0_i32_1 = arith.constant 0 : i32
    return %c0_i32, %c0_i32_0 : i32, i32
  }
  func.func @transform_5(%arg0: i32) -> (i32, i32) {
    %c0_i32 = arith.constant 0 : i32
    %c0_i32_0 = arith.constant 0 : i32
    %c0_i32_1 = arith.constant 0 : i32
    return %c0_i32, %c0_i32_0 : i32, i32
  }
  func.func @transform_6(%arg0: i32) -> (i32, i32, i32) {
    %c0_i32 = arith.constant 0 : i32
    %c0_i32_0 = arith.constant 0 : i32
    %c0_i32_1 = arith.constant 0 : i32
    return %arg0, %c0_i32, %c0_i32_0 : i32, i32, i32
  }
}

</mosaic_0001>

<bundles_post_ra>
// kernel: posterior_forward.3
= control target key start
LH: loop header
LB: loop body
LE: loop exit
PB: predicated region body
PF: predicated region fallthrough
CT: control target
= control target key end

     0   :  { %s1900_s15 = smov 0   ;;  %s2372_s0 = inlined_call_operand.vmem [shape: bf16[4,88,32], index: 0, kind: input, shape index: {}]   ;;  %s2373_s1 = inlined_call_operand.vmem [shape: bf16[4,32,32], index: 1, kind: input, shape index: {}]   ;;  %s2374_s2 = inlined_call_operand.vmem [shape: f32[1,32], index: 2, kind: input, shape index: {}]   ;;  %s2375_s3 = inlined_call_operand.vmem [shape: f32[72,1], index: 3, kind: input, shape index: {}]   ;;  %s2376_s4 = inlined_call_operand.vmem [shape: bf16[4,72,32], index: 4, kind: output, shape index: {}]  }
   0x1 LB: > { %s1463_s16 = sadd.s32 4294967295, %s1870_s15   ;;  %p1467_p0 = scmp.ge.s32.totalorder %s1870_s15, 1  ;;  %s1870_s15 = sphi %s1900_s15, %s14_s15  }
   0x2   : > { %p164_p1 = scmp.lt.s32.totalorder %s1870_s15, 3 }
   0x4   : > { %p165_p2 = pnand %p1467_p0, %p164_p1 }
   0x5   : > { %s1468_s23 = sshll.u32 (!%p165_p2), %s1463_s16, 1 }
   0x6   : > { %168 = sbr.rel (%p165_p2) target bundleno = 402 (0x192), region = 36  ;;  %p193_p3 = scmp.lt.s32.totalorder (!%p165_p2), %s1468_s23, 3 }
   0xb   : > { %v1845_v0 = vld [vmem:[%s2373_s1 + $0x8] sm:$0xff]   ;;  %v1872_v1 = vmov 0.0   ;;  %v1846_v2 = vld [vmem:[%s2373_s1 + $0x18] sm:$0xff]   ;;  %v1847_v3 = vld [vmem:[%s2373_s1] sm:$0xff]   ;;  %vm1873_vm0 = vmmov 0   ;;  %s2378_s23 = smov (!%p193_p3, %s1468_s23), 3 }
   0xc   : > { %1638 = vmatprep.subr.bf16.mxu0 %v1872_v1  ;;  %1686 = vmatprep.subr.bf16.mxu1 %v1872_v1  ;;  %v1848_v4 = vld [vmem:[%s2373_s1 + $0x10] sm:$0xff]   ;;  %s1830_s26 = smul.u32 44, %s2378_s23  ;;  %vm300_vm1 = vcmask 261120   ;;  %v1850_v5 = vld [vmem:[%s2373_s1 + $0x28] sm:$0xff]   ;;  %v1851_v6 = vld [vmem:[%s2373_s1 + $0x38] sm:$0xff]   ;;  %v1874_v17 = vmov 0  }
   0xd   : > { %1639 = vmatpush3.bf16.msra.mxu0 %v1845_v0  ;;  %1642 = vmatprep.mubr.msk.bf16.mxu0 %vm1873_vm0, %v1872_v1  ;;  %v1857_v8 = vld [vmem:[%s2373_s1 + $0x20] sm:$0xff]   ;;  %v1858_v9 = vld [vmem:[%s2373_s1 + $0x30] sm:$0xff]   ;;  %v1162_v19 = vld [vmem:[%s2375_s3 + $0x8] sm:$0xff]  ;;  %vm625_vm2 = vcmask 1046528   ;;  %vm1086_vm3 = vcmask 1045504   ;;  %s1831_s8 = smul.u32 36, %s2378_s23 }
   0xe   : > { %1687 = vmatpush3.bf16.msra.mxu1 %v1846_v2  ;;  %1640 = vmatprep.subr.bf16.mxu0 %v1872_v1  ;;  %s1936_s29 = scalar_lea.vmem %s2372_s0, %s1830_s26  ;;  %v1161_v15 = vld [vmem:[%s2375_s3] sm:$0xff]  ;;  %v1163_v16 = vld [vmem:[%s2375_s3 + $0x10] sm:$0xff]  ;;  %v1164_v20 = vld [vmem:[%s2375_s3 + $0x18] sm:$0xff]  ;;  %vm1386_vm5 = vcmask 257024  }
   0xf   : > { %1688 = vmatprep.subr.bf16.mxu1 %v1872_v1  ;;  %1690 = vmatprep.mubr.msk.bf16.mxu1 %vm1873_vm0, %v1872_v1  ;;  %v1945_v7 = vld [vmem:[%s1936_s29] sm:$0xff]   ;;  %v1964_v10 = vld [vmem:[%s1936_s29 + $0x8] sm:$0xff]   ;;  %v1975_v11 = vld [vmem:[%s1936_s29 + $0x10] sm:$0xff]   ;;  %s2239_s10 = scalar_lea.vmem %s2376_s4, %s1831_s8 }
  0x10   : > { %v1986_v12 = vld [vmem:[%s1936_s29 + $0x18] sm:$0xff]   ;;  %v1997_v13 = vld [vmem:[%s1936_s29 + $0x20] sm:$0xff]   ;;  %v2008_v14 = vld [vmem:[%s1936_s29 + $0x28] sm:$0xff]   ;;  %1843 = vset.pattern.permute.xlu0 %v1874_v17  ;;  %1844 = vset.pattern.permute.xlu1 %v1874_v17 }
  0x11   : > { %1641 = vmatpush3.bf16.msra.mxu0 %v1847_v3  ;;  %1251 = vperm.xlu0 %1843, %v1161_v15   ;;  %v2025_v18 = vld [vmem:[%s1936_s29 + $0x30] sm:$0xff]   ;;  %v1860_v21 = vld [vmem:[%s1936_s29 + $0x38] sm:$0xff]   ;;  %v1861_v22 = vld [vmem:[%s1936_s29 + $0x40] sm:$0xff]  }
  0x12   : > { %1689 = vmatpush3.bf16.msra.mxu1 %v1848_v4  ;;  %1734 = vmatprep.subr.bf16.mxu0 %v1872_v1  ;;  %v1165_v23 = vld [vmem:[%s2375_s3 + $0x20] sm:$0xff]  ;;  %v1862_v24 = vld [vmem:[%s1936_s29 + $0x48] sm:$0xff]   ;;  %v1167_v26 = vld [vmem:[%s2375_s3 + $0x30] sm:$0xff] }
  0x13   : > { %1782 = vmatprep.subr.bf16.mxu1 %v1872_v1  ;;  %1261 = vperm.xlu1 %1844, %v1163_v16   ;;  %v1166_v25 = vld [vmem:[%s2375_s3 + $0x28] sm:$0xff]  ;;  %v1863_v27 = vld [vmem:[%s1936_s29 + $0x50] sm:$0xff]   ;;  %v1168_v28 = vld [vmem:[%s2375_s3 + $0x38] sm:$0xff] }
  0x14   : > { %1643 = vmatmul.mubr.msk.bf16.vlgmr.msra.gmra.mxu0 %vm300_vm1, %v1945_v7  ;;  %v1169_v29 = vld [vmem:[%s2375_s3 + $0x40] sm:$0xff] }
  0x15   : > { %1691 = vmatmul.mubr.msk.bf16.vlgmr.msra.gmra.mxu1 %vm300_vm1, %v1945_v7  ;;  %1735 = vmatpush3.bf16.msra.mxu0 %v1850_v5 }
  0x16   : > { %1783 = vmatpush3.bf16.msra.mxu1 %v1851_v6  ;;  %1646 = vmatprep.mubr.msk.bf16.mxu0 %vm1873_vm0, %v1872_v1 }
  0x17   : > { %1694 = vmatprep.mubr.msk.bf16.mxu1 %vm1873_vm0, %v1872_v1  ;;  %1736 = vmatprep.subr.bf16.mxu0 %v1872_v1 }
  0x18   : > { %1784 = vmatprep.subr.bf16.mxu1 %v1872_v1  ;;  %1256 = vperm.xlu0 %1843, %v1162_v19  }
  0x19   : > { %1737 = vmatpush3.bf16.msra.mxu0 %v1857_v8  ;;  %1266 = vperm.xlu1 %1844, %v1164_v20  }
  0x1a   : > { %1785 = vmatpush3.bf16.msra.mxu1 %v1858_v9 }
  0x1c   : > { %1647 = vmatmul.mubr.msk.bf16.gmra.mxu0 %vm300_vm1, %v1964_v10  ;;  %1271 = vperm.xlu0 %1843, %v1165_v23  }
  0x1d   : > { %1695 = vmatmul.mubr.msk.bf16.gmra.mxu1 %vm300_vm1, %v1964_v10  ;;  %1650 = vmatprep.mubr.msk.bf16.mxu0 %vm1873_vm0, %v1872_v1 }
  0x1e   : > { %1698 = vmatprep.mubr.msk.bf16.mxu1 %vm1873_vm0, %v1872_v1  ;;  %1276 = vperm.xlu1 %1844, %v1166_v25  }
  0x20   : > { %1281 = vperm.xlu0 %1843, %v1167_v26  }
  0x22   : > { %1286 = vperm.xlu1 %1844, %v1168_v28  }
  0x24   : > { %1651 = vmatmul.mubr.msk.bf16.gmra.mxu0 %vm300_vm1, %v1975_v11  ;;  %1291 = vperm.xlu0 %1843, %v1169_v29  }
  0x25   : > { %1699 = vmatmul.mubr.msk.bf16.gmra.mxu1 %vm300_vm1, %v1975_v11  ;;  %1654 = vmatprep.mubr.msk.bf16.mxu0 %vm1873_vm0, %v1872_v1 }
  0x26   : > { %1702 = vmatprep.mubr.msk.bf16.mxu1 %vm1873_vm0, %v1872_v1 }
  0x2c   : > { %1655 = vmatmul.mubr.msk.bf16.gmra.mxu0 %vm300_vm1, %v1986_v12 }
  0x2d   : > { %1703 = vmatmul.mubr.msk.bf16.gmra.mxu1 %vm300_vm1, %v1986_v12  ;;  %1658 = vmatprep.mubr.msk.bf16.mxu0 %vm1873_vm0, %v1872_v1 }
  0x2e   : > { %1706 = vmatprep.mubr.msk.bf16.mxu1 %vm1873_vm0, %v1872_v1 }
  0x34   : > { %1659 = vmatmul.mubr.msk.bf16.gmra.mxu0 %vm300_vm1, %v1997_v13 }
  0x35   : > { %1707 = vmatmul.mubr.msk.bf16.gmra.mxu1 %vm300_vm1, %v1997_v13  ;;  %1662 = vmatprep.mubr.msk.bf16.mxu0 %vm1873_vm0, %v1872_v1 }
  0x36   : > { %1710 = vmatprep.mubr.msk.bf16.mxu1 %vm1873_vm0, %v1872_v1 }
  0x3c   : > { %1663 = vmatmul.mubr.msk.bf16.gmra.mxu0 %vm300_vm1, %v2008_v14 }
  0x3d   : > { %1711 = vmatmul.mubr.msk.bf16.gmra.mxu1 %vm300_vm1, %v2008_v14  ;;  %1666 = vmatprep.mubr.msk.bf16.mxu0 %vm1873_vm0, %v1872_v1 }
  0x3e   : > { %1714 = vmatprep.mubr.msk.bf16.mxu1 %vm1873_vm0, %v1872_v1 }
  0x44   : > { %1667 = vmatmul.mubr.msk.bf16.gmra.mxu0 %vm300_vm1, %v2025_v18 }
  0x45   : > { %1715 = vmatmul.mubr.msk.bf16.gmra.mxu1 %vm300_vm1, %v2025_v18  ;;  %1670 = vmatprep.mubr.msk.bf16.mxu0 %vm1873_vm0, %v1872_v1 }
  0x46   : > { %1718 = vmatprep.mubr.msk.bf16.mxu1 %vm1873_vm0, %v1872_v1 }
  0x4c   : > { %1671 = vmatmul.mubr.msk.bf16.gmra.mxu0 %vm300_vm1, %v1860_v21 }
  0x4d   : > { %1719 = vmatmul.mubr.msk.bf16.gmra.mxu1 %vm300_vm1, %v1860_v21  ;;  %1674 = vmatprep.mubr.msk.bf16.mxu0 %vm1873_vm0, %v1872_v1 }
  0x4e   : > { %1722 = vmatprep.mubr.msk.bf16.mxu1 %vm1873_vm0, %v1872_v1 }
  0x54   : > { %1675 = vmatmul.mubr.msk.bf16.gmra.mxu0 %vm300_vm1, %v1861_v22 }
  0x55   : > { %1723 = vmatmul.mubr.msk.bf16.gmra.mxu1 %vm300_vm1, %v1861_v22  ;;  %1678 = vmatprep.mubr.msk.bf16.mxu0 %vm1873_vm0, %v1872_v1 }
  0x56   : > { %1726 = vmatprep.mubr.msk.bf16.mxu1 %vm1873_vm0, %v1872_v1 }
  0x5c   : > { %1679 = vmatmul.mubr.msk.bf16.gmra.mxu0 %vm300_vm1, %v1862_v24 }
  0x5d   : > { %1727 = vmatmul.mubr.msk.bf16.gmra.mxu1 %vm300_vm1, %v1862_v24  ;;  %1682 = vmatprep.mubr.msk.bf16.mxu0 %vm1873_vm0, %v1872_v1 }
  0x5e   : > { %1730 = vmatprep.mubr.msk.bf16.mxu1 %vm1873_vm0, %v1872_v1 }
  0x64   : > { %1683 = vmatmul.mubr.msk.bf16.gmra.mxu0 %vm300_vm1, %v1863_v27 }
  0x65   : > { %1731 = vmatmul.mubr.msk.bf16.gmra.mxu1 %vm300_vm1, %v1863_v27  ;;  %1738 = vmatprep.mubr.msk.bf16.mxu0 %vm1873_vm0, %v1872_v1 }
  0x66   : > { %1786 = vmatprep.mubr.msk.bf16.mxu1 %vm1873_vm0, %v1872_v1 }
  0x6c   : > { %1739 = vmatmul.mubr.msk.bf16.vlgmr.msra.gmra.mxu0 %vm300_vm1, %v1945_v7 }
  0x6d   : > { %1787 = vmatmul.mubr.msk.bf16.vlgmr.msra.gmra.mxu1 %vm300_vm1, %v1945_v7  ;;  %1742 = vmatprep.mubr.msk.bf16.mxu0 %vm1873_vm0, %v1872_v1 }
  0x6e   : > { %1790 = vmatprep.mubr.msk.bf16.mxu1 %vm1873_vm0, %v1872_v1 }
  0x74   : > { %1743 = vmatmul.mubr.msk.bf16.gmra.mxu0 %vm300_vm1, %v1964_v10 }
  0x75   : > { %1791 = vmatmul.mubr.msk.bf16.gmra.mxu1 %vm300_vm1, %v1964_v10  ;;  %1746 = vmatprep.mubr.msk.bf16.mxu0 %vm1873_vm0, %v1872_v1 }
  0x76   : > { %1794 = vmatprep.mubr.msk.bf16.mxu1 %vm1873_vm0, %v1872_v1 }
  0x7c   : > { %1747 = vmatmul.mubr.msk.bf16.gmra.mxu0 %vm300_vm1, %v1975_v11 }
  0x7d   : > { %1795 = vmatmul.mubr.msk.bf16.gmra.mxu1 %vm300_vm1, %v1975_v11  ;;  %1750 = vmatprep.mubr.msk.bf16.mxu0 %vm1873_vm0, %v1872_v1 }
  0x7e   : > { %1798 = vmatprep.mubr.msk.bf16.mxu1 %vm1873_vm0, %v1872_v1 }
  0x84   : > { %1751 = vmatmul.mubr.msk.bf16.gmra.mxu0 %vm300_vm1, %v1986_v12 }
  0x85   : > { %1799 = vmatmul.mubr.msk.bf16.gmra.mxu1 %vm300_vm1, %v1986_v12  ;;  %1754 = vmatprep.mubr.msk.bf16.mxu0 %vm1873_vm0, %v1872_v1 }
  0x86   : > { %1802 = vmatprep.mubr.msk.bf16.mxu1 %vm1873_vm0, %v1872_v1 }
  0x8c   : > { %1755 = vmatmul.mubr.msk.bf16.gmra.mxu0 %vm300_vm1, %v1997_v13 }
  0x8d   : > { %1803 = vmatmul.mubr.msk.bf16.gmra.mxu1 %vm300_vm1, %v1997_v13  ;;  %1758 = vmatprep.mubr.msk.bf16.mxu0 %vm1873_vm0, %v1872_v1 }
  0x8e   : > { %1806 = vmatprep.mubr.msk.bf16.mxu1 %vm1873_vm0, %v1872_v1 }
  0x94   : > { %1759 = vmatmul.mubr.msk.bf16.gmra.mxu0 %vm300_vm1, %v2008_v14 }
  0x95   : > { %1807 = vmatmul.mubr.msk.bf16.gmra.mxu1 %vm300_vm1, %v2008_v14  ;;  %1762 = vmatprep.mubr.msk.bf16.mxu0 %vm1873_vm0, %v1872_v1 }
  0x96   : > { %1810 = vmatprep.mubr.msk.bf16.mxu1 %vm1873_vm0, %v1872_v1 }
  0x9c   : > { %1763 = vmatmul.mubr.msk.bf16.gmra.mxu0 %vm300_vm1, %v2025_v18 }
  0x9d   : > { %1811 = vmatmul.mubr.msk.bf16.gmra.mxu1 %vm300_vm1, %v2025_v18  ;;  %1766 = vmatprep.mubr.msk.bf16.mxu0 %vm1873_vm0, %v1872_v1 }
  0x9e   : > { %1814 = vmatprep.mubr.msk.bf16.mxu1 %vm1873_vm0, %v1872_v1 }
  0xa4   : > { %1767 = vmatmul.mubr.msk.bf16.gmra.mxu0 %vm300_vm1, %v1860_v21 }
  0xa5   : > { %1815 = vmatmul.mubr.msk.bf16.gmra.mxu1 %vm300_vm1, %v1860_v21  ;;  %1770 = vmatprep.mubr.msk.bf16.mxu0 %vm1873_vm0, %v1872_v1 }
  0xa6   : > { %1818 = vmatprep.mubr.msk.bf16.mxu1 %vm1873_vm0, %v1872_v1 }
  0xac   : > { %1771 = vmatmul.mubr.msk.bf16.gmra.mxu0 %vm300_vm1, %v1861_v22 }
  0xad   : > { %1819 = vmatmul.mubr.msk.bf16.gmra.mxu1 %vm300_vm1, %v1861_v22  ;;  %1774 = vmatprep.mubr.msk.bf16.mxu0 %vm1873_vm0, %v1872_v1 }
  0xae   : > { %1822 = vmatprep.mubr.msk.bf16.mxu1 %vm1873_vm0, %v1872_v1 }
  0xb4   : > { %1775 = vmatmul.mubr.msk.bf16.gmra.mxu0 %vm300_vm1, %v1862_v24 }
  0xb5   : > { %1823 = vmatmul.mubr.msk.bf16.gmra.mxu1 %vm300_vm1, %v1862_v24  ;;  %1778 = vmatprep.mubr.msk.bf16.mxu0 %vm1873_vm0, %v1872_v1 }
  0xb6   : > { %1826 = vmatprep.mubr.msk.bf16.mxu1 %vm1873_vm0, %v1872_v1 }
  0xbc   : > { %1779 = vmatmul.mubr.msk.bf16.gmra.mxu0 %vm300_vm1, %v1863_v27 }
  0xbd   : > { %1827 = vmatmul.mubr.msk.bf16.gmra.mxu1 %vm300_vm1, %v1863_v27 }
  0xd4   : > { %v368_v30 = vpop.f32.mrf.mxu0 }
  0xd5   : > { %v520_v31 = vpop.f32.mrf.mxu1 }
  0xd6   : > { %v1644_v32 = vpop.f32.mrf.mxu0  ;;  %v626_v36 = vrot.slane %v520_v31, 1 }
  0xd7   : > { %v1692_v33 = vpop.f32.mrf.mxu1 }
  0xd8   : > { %v371_v34 = vpop.f32.mrf.mxu0 }
  0xd9   : > { %v523_v35 = vpop.f32.mrf.mxu1 }
  0xda   : > { %v627_v37 = vrot.slane %v523_v35, 1  ;;  %v1645_v38 = vpop.f32.mrf.mxu0 }
  0xdb   : > { %v1693_v39 = vpop.f32.mrf.mxu1 }
  0xdc   : > { %v628_v40 = vsel %vm625_vm2, %v626_v36, %v627_v37  ;;  %v376_v42 = vpop.f32.mrf.mxu0 }
  0xdd   : > { %v2161_v41 = vadd.f32 %v628_v40, %v368_v30  ;;  %v528_v43 = vpop.f32.mrf.mxu1 }
  0xde   : > { %v629_v44 = vrot.slane %v528_v43, 1  ;;  %v1648_v45 = vpop.f32.mrf.mxu0 }
  0xdf   : > { %v1696_v46 = vpop.f32.mrf.mxu1 }
  0xe0   : > { %v630_v47 = vsel %vm625_vm2, %v627_v37, %v629_v44  ;;  %v379_v49 = vpop.f32.mrf.mxu0 }
  0xe1   : > { %v2164_v48 = vadd.f32 %v630_v47, %v371_v34  ;;  %v531_v50 = vpop.f32.mrf.mxu1 }
  0xe2   : > { %v631_v51 = vrot.slane %v531_v50, 1  ;;  %v1649_v52 = vpop.f32.mrf.mxu0 }
  0xe3   : > { %v1697_v53 = vpop.f32.mrf.mxu1 }
  0xe4   : > { %v632_v54 = vsel %vm625_vm2, %v629_v44, %v631_v51  ;;  %v384_v56 = vpop.f32.mrf.mxu0 }
  0xe5   : > { %v2167_v55 = vadd.f32 %v632_v54, %v376_v42  ;;  %v536_v57 = vpop.f32.mrf.mxu1 }
  0xe6   : > { %v633_v58 = vrot.slane %v536_v57, 1  ;;  %v1652_v59 = vpop.f32.mrf.mxu0 }
  0xe7   : > { %v1700_v60 = vpop.f32.mrf.mxu1 }
  0xe8   : > { %v634_v61 = vsel %vm625_vm2, %v631_v51, %v633_v58  ;;  %v387_v63 = vpop.f32.mrf.mxu0 }
  0xe9   : > { %v2170_v62 = vadd.f32 %v634_v61, %v379_v49  ;;  %v539_v0 = vpop.f32.mrf.mxu1 }
  0xea   : > { %v635_v1 = vrot.slane %v539_v0, 1  ;;  %v1653_v2 = vpop.f32.mrf.mxu0 }
  0xeb   : > { %v1701_v3 = vpop.f32.mrf.mxu1 }
  0xec   : > { %v636_v4 = vsel %vm625_vm2, %v633_v58, %v635_v1  ;;  %v392_v6 = vpop.f32.mrf.mxu0 }
  0xed   : > { %v2173_v5 = vadd.f32 %v636_v4, %v384_v56  ;;  %v544_v7 = vpop.f32.mrf.mxu1 }
  0xee   : > { %v637_v8 = vrot.slane %v544_v7, 1  ;;  %v1656_v9 = vpop.f32.mrf.mxu0 }
  0xef   : > { %v1704_v10 = vpop.f32.mrf.mxu1 }
  0xf0   : > { %v638_v11 = vsel %vm625_vm2, %v635_v1, %v637_v8  ;;  %v395_v13 = vpop.f32.mrf.mxu0 }
  0xf1   : > { %v2176_v12 = vadd.f32 %v638_v11, %v387_v63  ;;  %v547_v14 = vpop.f32.mrf.mxu1 }
  0xf2   : > { %v639_v15 = vrot.slane %v547_v14, 1  ;;  %v1657_v16 = vpop.f32.mrf.mxu0 }
  0xf3   : > { %v1705_v17 = vpop.f32.mrf.mxu1 }
  0xf4   : > { %v640_v18 = vsel %vm625_vm2, %v637_v8, %v639_v15  ;;  %v400_v20 = vpop.f32.mrf.mxu0 }
  0xf5   : > { %v2179_v19 = vadd.f32 %v640_v18, %v392_v6  ;;  %v552_v21 = vpop.f32.mrf.mxu1 }
  0xf6   : > { %v641_v22 = vrot.slane %v552_v21, 1  ;;  %v1660_v23 = vpop.f32.mrf.mxu0 }
  0xf7   : > { %v1708_v24 = vpop.f32.mrf.mxu1 }
  0xf8   : > { %v642_v25 = vsel %vm625_vm2, %v639_v15, %v641_v22  ;;  %v403_v27 = vpop.f32.mrf.mxu0 }
  0xf9   : > { %v2182_v26 = vadd.f32 %v642_v25, %v395_v13  ;;  %v555_v28 = vpop.f32.mrf.mxu1 }
  0xfa   : > { %v643_v29 = vrot.slane %v555_v28, 1  ;;  %v1661_v30 = vpop.f32.mrf.mxu0 }
  0xfb   : > { %v1709_v31 = vpop.f32.mrf.mxu1 }
  0xfc   : > { %v644_v32 = vsel %vm625_vm2, %v641_v22, %v643_v29  ;;  %v407_v34 = vpop.f32.mrf.mxu0 }
  0xfd   : > { %v2185_v33 = vadd.f32 %v644_v32, %v400_v20  ;;  %v560_v35 = vpop.f32.mrf.mxu1 }
  0xfe   : > { %v1664_v36 = vpop.f32.mrf.mxu0 }
  0xff   : > { %v1712_v37 = vpop.f32.mrf.mxu1 }
 0x100   : > { %v409_v38 = vpop.f32.mrf.mxu0 }
 0x101   : > { %v562_v39 = vpop.f32.mrf.mxu1 }
 0x102   : > { %v1665_v40 = vpop.f32.mrf.mxu0  ;;  %v645_v45 = vrot.slane %v562_v39, 1 }
 0x103   : > { %v1713_v42 = vpop.f32.mrf.mxu1 }
 0x104   : > { %v414_v43 = vpop.f32.mrf.mxu0 }
 0x105   : > { %v567_v44 = vpop.f32.mrf.mxu1 }
 0x106   : > { %v646_v46 = vrot.slane %v567_v44, 1  ;;  %v1668_v47 = vpop.f32.mrf.mxu0 }
 0x107   : > { %v1716_v49 = vpop.f32.mrf.mxu1 }
 0x108   : > { %v647_v50 = vsel %vm625_vm2, %v645_v45, %v646_v46  ;;  %v417_v52 = vpop.f32.mrf.mxu0 }
 0x109   : > { %v2188_v51 = vadd.f32 %v647_v50, %v409_v38  ;;  %v570_v53 = vpop.f32.mrf.mxu1 }
 0x10a   : > { %v648_v54 = vrot.slane %v570_v53, 1  ;;  %v1669_v56 = vpop.f32.mrf.mxu0 }
 0x10b   : > { %v1717_v57 = vpop.f32.mrf.mxu1 }
 0x10c   : > { %v649_v58 = vsel %vm625_vm2, %v646_v46, %v648_v54  ;;  %v422_v60 = vpop.f32.mrf.mxu0 }
 0x10d   : > { %v2191_v59 = vadd.f32 %v649_v58, %v414_v43  ;;  %v575_v61 = vpop.f32.mrf.mxu1 }
 0x10e   : > { %v650_v63 = vrot.slane %v575_v61, 1  ;;  %v1672_v0 = vpop.f32.mrf.mxu0 }
 0x10f   : > { %v1720_v1 = vpop.f32.mrf.mxu1 }
 0x110   : > { %v651_v2 = vsel %vm625_vm2, %v648_v54, %v650_v63  ;;  %v425_v4 = vpop.f32.mrf.mxu0 }
 0x111   : > { %v2194_v3 = vadd.f32 %v651_v2, %v417_v52  ;;  %v578_v6 = vpop.f32.mrf.mxu1 }
 0x112   : > { %v652_v7 = vrot.slane %v578_v6, 1  ;;  %v1673_v8 = vpop.f32.mrf.mxu0 }
 0x113   : > { %v1721_v9 = vpop.f32.mrf.mxu1 }
 0x114   : > { %v653_v10 = vsel %vm625_vm2, %v650_v63, %v652_v7  ;;  %v430_v13 = vpop.f32.mrf.mxu0 }
 0x115   : > { %v2197_v11 = vadd.f32 %v653_v10, %v422_v60  ;;  %v583_v14 = vpop.f32.mrf.mxu1 }
 0x116   : > { %v654_v15 = vrot.slane %v583_v14, 1  ;;  %v1676_v16 = vpop.f32.mrf.mxu0 }
 0x117   : > { %v1724_v17 = vpop.f32.mrf.mxu1 }
 0x118   : > { %v655_v18 = vsel %vm625_vm2, %v652_v7, %v654_v15  ;;  %v433_v21 = vpop.f32.mrf.mxu0 }
 0x119   : > { %v2200_v20 = vadd.f32 %v655_v18, %v425_v4  ;;  %v586_v22 = vpop.f32.mrf.mxu1 }
 0x11a   : > { %v656_v23 = vrot.slane %v586_v22, 1  ;;  %v1677_v24 = vpop.f32.mrf.mxu0 }
 0x11b   : > { %v1725_v25 = vpop.f32.mrf.mxu1 }
 0x11c   : > { %v657_v27 = vsel %vm625_vm2, %v654_v15, %v656_v23  ;;  %v438_v29 = vpop.f32.mrf.mxu0 }
 0x11d   : > { %v2203_v28 = vadd.f32 %v657_v27, %v430_v13  ;;  %v591_v30 = vpop.f32.mrf.mxu1  ;;  %v2220_v27 = vld [vmem:[%s2374_s2] ss:$0 sm:$0xff] }
 0x11e   : > { %v658_v31 = vrot.slane %v591_v30, 1  ;;  %v1680_v32 = vpop.f32.mrf.mxu0 }
 0x11f   : > { %v1728_v34 = vpop.f32.mrf.mxu1 }
 0x120   : > { %v659_v35 = vsel %vm625_vm2, %v656_v23, %v658_v31  ;;  %v441_v37 = vpop.f32.mrf.mxu0  ;;  %v2223_v34 = vpop.permute.xlu0 %1251 }
 0x121   : > { %v2206_v36 = vadd.f32 %v659_v35, %v433_v21  ;;  %v594_v38 = vpop.f32.mrf.mxu1 }
 0x122   : > { %v660_v39 = vrot.slane %v594_v38, 1  ;;  %v1681_v40 = vpop.f32.mrf.mxu0 }
 0x123   : > { %v1729_v42 = vpop.f32.mrf.mxu1 }
 0x124   : > { %v661_v43 = vsel %vm625_vm2, %v658_v31, %v660_v39  ;;  %v446_v45 = vpop.f32.mrf.mxu0 }
 0x125   : > { %v2209_v44 = vadd.f32 %v661_v43, %v438_v29  ;;  %v599_v46 = vpop.f32.mrf.mxu1 }
 0x126   : > { %v662_v47 = vrot.slane %v599_v46, 1  ;;  %v1684_v49 = vpop.f32.mrf.mxu0 }
 0x127   : > { %v1732_v50 = vpop.f32.mrf.mxu1 }
 0x128   : > { %v663_v52 = vsel %vm625_vm2, %v660_v39, %v662_v47  ;;  %v448_v54 = vpop.f32.mrf.mxu0 }
 0x129   : > { %v2212_v53 = vadd.f32 %v663_v52, %v441_v37  ;;  %v602_v56 = vpop.f32.mrf.mxu1 }
 0x12a   : > { %v1685_v57 = vpop.f32.mrf.mxu0 }
 0x12b   : > { %v1733_v58 = vpop.f32.mrf.mxu1 }
 0x12c   : > { %v751_v60 = vpop.f32.mrf.mxu0 }
 0x12d   : > { %v981_v61 = vpop.f32.mrf.mxu1 }
 0x12e   : > { %v1740_v63 = vpop.f32.mrf.mxu0 }
 0x12f   : > { %v1788_v0 = vpop.f32.mrf.mxu1  ;;  %v2234_v63 = vpop.permute.xlu0 %1256 }
 0x130   : > { %v753_v1 = vpop.f32.mrf.mxu0 }
 0x131   : > { %v983_v2 = vpop.f32.mrf.mxu1  ;;  %v856_v9 = vrot.slane %v753_v1, 1 }
 0x132   : > { %v1741_v4 = vpop.f32.mrf.mxu0  ;;  %v1087_v16 = vrot.slane %v983_v2, 2 }
 0x133   : > { %v1789_v6 = vpop.f32.mrf.mxu1 }
 0x134   : > { %v758_v7 = vpop.f32.mrf.mxu0 }
 0x135   : > { %v988_v8 = vpop.f32.mrf.mxu1  ;;  %v857_v10 = vrot.slane %v758_v7, 1  ;;  %v2242_v7 = vpop.permute.xlu1 %1261 }
 0x136   : > { %v1088_v13 = vrot.slane %v988_v8, 2  ;;  %v1744_v14 = vpop.f32.mrf.mxu0 }
 0x137   : > { %v1792_v15 = vpop.f32.mrf.mxu1  ;;  %v858_v17 = vsel %vm625_vm2, %v856_v9, %v857_v10 }
 0x138   : > { %v912_v18 = vadd.f32 %v858_v17, %v2161_v41  ;;  %v761_v21 = vpop.f32.mrf.mxu0  ;;  %v1089_v23 = vsel %vm1086_vm3, %v1087_v16, %v1088_v13 }
 0x139   : > { %v991_v22 = vpop.f32.mrf.mxu1  ;;  %v859_v24 = vrot.slane %v761_v21, 1 }
 0x13a   : > { %v1090_v25 = vrot.slane %v991_v22, 2  ;;  %v1143_v29 = vadd.f32 %v1089_v23, %v912_v18  ;;  %v1745_v30 = vpop.f32.mrf.mxu0 }
 0x13b   : > { %v1793_v31 = vpop.f32.mrf.mxu1  ;;  %v860_v32 = vsel %vm625_vm2, %v857_v10, %v859_v24 }
 0x13c   : > { %v913_v41 = vadd.f32 %v860_v32, %v2164_v48  ;;  %v766_v35 = vpop.f32.mrf.mxu0  ;;  %v1177_v38 = vadd.f32 %v2220_v27, %v1143_v29  ;;  %v1091_v39 = vsel %vm1086_vm3, %v1088_v13, %v1090_v25 }
 0x13d   : > { %v996_v37 = vpop.f32.mrf.mxu1  ;;  %v861_v40 = vrot.slane %v766_v35, 1 }
 0x13e   : > { %v1092_v42 = vrot.slane %v996_v37, 2  ;;  %v1144_v43 = vadd.f32 %v1091_v39, %v913_v41  ;;  %v1748_v45 = vpop.f32.mrf.mxu0  ;;  %vm1195_vm4 = vcmp.ge.f32.partialorder %v1177_v38, 0.0  ;;  %v1213_v47 = vmul.f32 0.2, %v1177_v38 }
 0x13f   : > { %v1796_v46 = vpop.f32.mrf.mxu1  ;;  %v862_v49 = vsel %vm625_vm2, %v859_v24, %v861_v40 }
 0x140   : > { %v914_v50 = vadd.f32 %v862_v49, %v2167_v55  ;;  %v1231_v52 = vsel %vm1195_vm4, %v1177_v38, %v1213_v47  ;;  %v769_v48 = vpop.f32.mrf.mxu0  ;;  %v1178_v56 = vadd.f32 %v2220_v27, %v1144_v43  ;;  %v1093_v57 = vsel %vm1086_vm3, %v1090_v25, %v1092_v42 }
 0x141   : > { %v999_v54 = vpop.f32.mrf.mxu1  ;;  %v1294_v58 = vmul.f32 %v2223_v34, %v1231_v52  ;;  %v863_v60 = vrot.slane %v769_v48, 1 }
 0x142   : > { %v1094_v61 = vrot.slane %v999_v54, 2  ;;  %v1145_v0 = vadd.f32 %v1093_v57, %v914_v50  ;;  %v1749_v55 = vpop.f32.mrf.mxu0  ;;  %vm1196_vm6 = vcmp.ge.f32.partialorder %v1178_v56, 0.0  ;;  %v1214_v2 = vmul.f32 0.2, %v1178_v56 }
 0x143   : > { %v1797_v1 = vpop.f32.mrf.mxu1  ;;  %v1568_v4 = vpack.c.bf16 %v1294_v58, %v1294_v58  ;;  %v864_v6 = vsel %vm625_vm2, %v861_v40, %v863_v60  ;;  %v2257_v40 = vpop.permute.xlu1 %1266 }
 0x144   : > { %v915_v8 = vadd.f32 %v864_v6, %v2170_v62  ;;  %v1232_v9 = vsel %vm1196_vm6, %v1178_v56, %v1214_v2  ;;  %v774_v10 = vpop.f32.mrf.mxu0  ;;  %v1179_v14 = vadd.f32 %v2220_v27, %v1145_v0  ;;  %v1095_v15 = vsel %vm1086_vm3, %v1092_v42, %v1094_v61 }
 0x145   : > { %v1004_v13 = vpop.f32.mrf.mxu1  ;;  %1387 = vst.msk [vmem:[%s2239_s10] sm:$0xf] %vm1386_vm5, %v1568_v4  ;;  %v1295_v16 = vmul.f32 %v2234_v63, %v1232_v9  ;;  %v865_v17 = vrot.slane %v774_v10, 1 }
 0x146   : > { %v1096_v18 = vrot.slane %v1004_v13, 2  ;;  %v1146_v21 = vadd.f32 %v1095_v15, %v915_v8  ;;  %v1752_v22 = vpop.f32.mrf.mxu0  ;;  %vm1197_vm7 = vcmp.ge.f32.partialorder %v1179_v14, 0.0  ;;  %v1215_v24 = vmul.f32 0.2, %v1179_v14 }
 0x147   : > { %v1800_v23 = vpop.f32.mrf.mxu1  ;;  %v1569_v62 = vpack.c.bf16 %v1295_v16, %v1295_v16  ;;  %v866_v25 = vsel %vm625_vm2, %v863_v60, %v865_v17 }
 0x148   : > { %v916_v29 = vadd.f32 %v866_v25, %v2173_v5  ;;  %v1233_v30 = vsel %vm1197_vm7, %v1179_v14, %v1215_v24  ;;  %v777_v31 = vpop.f32.mrf.mxu0  ;;  %v1180_v41 = vadd.f32 %v2220_v27, %v1146_v21  ;;  %v1097_v35 = vsel %vm1086_vm3, %v1094_v61, %v1096_v18  ;;  %v2266_v61 = vpop.permute.xlu0 %1271 }
 0x149   : > { %v1007_v32 = vpop.f32.mrf.mxu1  ;;  %1388 = vst.msk [vmem:[%s2239_s10 + $0x4] sm:$0xf] %vm1386_vm5, %v1569_v62  ;;  %v1296_v37 = vmul.f32 %v2242_v7, %v1233_v30  ;;  %v867_v38 = vrot.slane %v777_v31, 1 }
 0x14a   : > { %v1098_v39 = vrot.slane %v1007_v32, 2  ;;  %v1147_v42 = vadd.f32 %v1097_v35, %v916_v29  ;;  %v1753_v43 = vpop.f32.mrf.mxu0  ;;  %vm1198_vm8 = vcmp.ge.f32.partialorder %v1180_v41, 0.0  ;;  %v1216_v5 = vmul.f32 0.2, %v1180_v41 }
 0x14b   : > { %v1801_v45 = vpop.f32.mrf.mxu1  ;;  %v1570_v46 = vpack.c.bf16 %v1296_v37, %v1296_v37  ;;  %v868_v47 = vsel %vm625_vm2, %v865_v17, %v867_v38 }
 0x14c   : > { %v917_v49 = vadd.f32 %v868_v47, %v2176_v12  ;;  %v1234_v50 = vsel %vm1198_vm8, %v1180_v41, %v1216_v5  ;;  %v782_v52 = vpop.f32.mrf.mxu0  ;;  %v1181_v54 = vadd.f32 %v2220_v27, %v1147_v42  ;;  %v1099_v56 = vsel %vm1086_vm3, %v1096_v18, %v1098_v39  ;;  %v2275_v18 = vpop.permute.xlu1 %1276 }
 0x14d   : > { %v1012_v48 = vpop.f32.mrf.mxu1  ;;  %1389 = vst.msk [vmem:[%s2239_s10 + $0x8] sm:$0xf] %vm1386_vm5, %v1570_v46  ;;  %v1297_v57 = vmul.f32 %v2257_v40, %v1234_v50  ;;  %v869_v58 = vrot.slane %v782_v52, 1 }
 0x14e   : > { %v1100_v60 = vrot.slane %v1012_v48, 2  ;;  %v1148_v0 = vadd.f32 %v1099_v56, %v917_v49  ;;  %v1756_v55 = vpop.f32.mrf.mxu0  ;;  %vm1199_vm9 = vcmp.ge.f32.partialorder %v1181_v54, 0.0  ;;  %v1217_v12 = vmul.f32 0.2, %v1181_v54 }
 0x14f   : > { %v1804_v1 = vpop.f32.mrf.mxu1  ;;  %v1571_v2 = vpack.c.bf16 %v1297_v57, %v1297_v57  ;;  %v870_v4 = vsel %vm625_vm2, %v867_v38, %v869_v58 }
 0x150   : > { %v918_v6 = vadd.f32 %v870_v4, %v2179_v19  ;;  %v1235_v8 = vsel %vm1199_vm9, %v1181_v54, %v1217_v12  ;;  %v785_v9 = vpop.f32.mrf.mxu0  ;;  %v1182_v13 = vadd.f32 %v2220_v27, %v1148_v0  ;;  %v1101_v14 = vsel %vm1086_vm3, %v1098_v39, %v1100_v60  ;;  %v2284_v39 = vpop.permute.xlu0 %1281 }
 0x151   : > { %v1015_v10 = vpop.f32.mrf.mxu1  ;;  %1390 = vst.msk [vmem:[%s2239_s10 + $0xc] sm:$0xf] %vm1386_vm5, %v1571_v2  ;;  %v1298_v15 = vmul.f32 %v2266_v61, %v1235_v8  ;;  %v871_v16 = vrot.slane %v785_v9, 1  ;;  %v2293_v57 = vpop.permute.xlu1 %1286 }
 0x152   : > { %v1102_v17 = vrot.slane %v1015_v10, 2  ;;  %v1149_v21 = vadd.f32 %v1101_v14, %v918_v6  ;;  %v1757_v22 = vpop.f32.mrf.mxu0  ;;  %vm1200_vm10 = vcmp.ge.f32.partialorder %v1182_v13, 0.0  ;;  %v1218_v19 = vmul.f32 0.2, %v1182_v13 }
 0x153   : > { %v1805_v23 = vpop.f32.mrf.mxu1  ;;  %v1572_v24 = vpack.c.bf16 %v1298_v15, %v1298_v15  ;;  %v872_v62 = vsel %vm625_vm2, %v869_v58, %v871_v16 }
 0x154   : > { %v919_v25 = vadd.f32 %v872_v62, %v2182_v26  ;;  %v1236_v29 = vsel %vm1200_vm10, %v1182_v13, %v1218_v19  ;;  %v790_v30 = vpop.f32.mrf.mxu0  ;;  %v1183_v32 = vadd.f32 %v2220_v27, %v1149_v21  ;;  %v1103_v41 = vsel %vm1086_vm3, %v1100_v60, %v1102_v17  ;;  %v2299_v8 = vpop.permute.xlu0 %1291 }
 0x155   : > { %v1020_v31 = vpop.f32.mrf.mxu1  ;;  %1391 = vst.msk [vmem:[%s2239_s10 + $0x10] sm:$0xf] %vm1386_vm5, %v1572_v24  ;;  %v1299_v35 = vmul.f32 %v2275_v18, %v1236_v29  ;;  %v873_v37 = vrot.slane %v790_v30, 1 }
 0x156   : > { %v1104_v38 = vrot.slane %v1020_v31, 2  ;;  %v1150_v42 = vadd.f32 %v1103_v41, %v919_v25  ;;  %v1760_v43 = vpop.f32.mrf.mxu0  ;;  %vm1201_vm11 = vcmp.ge.f32.partialorder %v1183_v32, 0.0  ;;  %v1219_v26 = vmul.f32 0.2, %v1183_v32 }
 0x157   : > { %v1808_v45 = vpop.f32.mrf.mxu1  ;;  %v1573_v5 = vpack.c.bf16 %v1299_v35, %v1299_v35  ;;  %v874_v46 = vsel %vm625_vm2, %v871_v16, %v873_v37 }
 0x158   : > { %v920_v47 = vadd.f32 %v874_v46, %v2185_v33  ;;  %v1237_v49 = vsel %vm1201_vm11, %v1183_v32, %v1219_v26  ;;  %v793_v50 = vpop.f32.mrf.mxu0  ;;  %v1184_v48 = vadd.f32 %v2220_v27, %v1150_v42  ;;  %v1105_v54 = vsel %vm1086_vm3, %v1102_v17, %v1104_v38 }
 0x159   : > { %v1023_v52 = vpop.f32.mrf.mxu1  ;;  %1392 = vst.msk [vmem:[%s2239_s10 + $0x14] sm:$0xf] %vm1386_vm5, %v1573_v5  ;;  %v1300_v56 = vmul.f32 %v2284_v39, %v1237_v49 }
 0x15a   : > { %v1151_v58 = vadd.f32 %v1105_v54, %v920_v47  ;;  %v1761_v60 = vpop.f32.mrf.mxu0  ;;  %vm1202_vm12 = vcmp.ge.f32.partialorder %v1184_v48, 0.0  ;;  %v1220_v55 = vmul.f32 0.2, %v1184_v48 }
 0x15b   : > { %v1809_v0 = vpop.f32.mrf.mxu1  ;;  %v1574_v33 = vpack.c.bf16 %v1300_v56, %v1300_v56 }
 0x15c   : > { %v1238_v1 = vsel %vm1202_vm12, %v1184_v48, %v1220_v55  ;;  %v797_v12 = vpop.f32.mrf.mxu0  ;;  %v1185_v4 = vadd.f32 %v2220_v27, %v1151_v58 }
 0x15d   : > { %v1027_v2 = vpop.f32.mrf.mxu1  ;;  %1393 = vst.msk [vmem:[%s2239_s10 + $0x18] sm:$0xf] %vm1386_vm5, %v1574_v33  ;;  %v1301_v6 = vmul.f32 %v2293_v57, %v1238_v1  ;;  %v875_v21 = vrot.slane %v797_v12, 1 }
 0x15e   : > { %v1764_v9 = vpop.f32.mrf.mxu0  ;;  %vm1203_vm13 = vcmp.ge.f32.partialorder %v1185_v4, 0.0  ;;  %v1221_v13 = vmul.f32 0.2, %v1185_v4  ;;  %v1106_v25 = vrot.slane %v1027_v2, 2 }
 0x15f   : > { %v1812_v10 = vpop.f32.mrf.mxu1  ;;  %v1575_v14 = vpack.c.bf16 %v1301_v6, %v1301_v6 }
 0x160   : > { %v1239_v15 = vsel %vm1203_vm13, %v1185_v4, %v1221_v13  ;;  %v800_v16 = vpop.f32.mrf.mxu0 }
 0x161   : > { %v1030_v17 = vpop.f32.mrf.mxu1  ;;  %1394 = vst.msk [vmem:[%s2239_s10 + $0x1c] sm:$0xf] %vm1386_vm5, %v1575_v14  ;;  %v1302_v22 = vmul.f32 %v2299_v8, %v1239_v15  ;;  %v876_v23 = vrot.slane %v800_v16, 1 }
 0x162   : > { %v1107_v19 = vrot.slane %v1030_v17, 2  ;;  %v1765_v24 = vpop.f32.mrf.mxu0 }
 0x163   : > { %v1813_v62 = vpop.f32.mrf.mxu1  ;;  %v1576_v29 = vpack.c.bf16 %v1302_v22, %v1302_v22  ;;  %v877_v30 = vsel %vm625_vm2, %v875_v21, %v876_v23 }
 0x164   : > { %v921_v31 = vadd.f32 %v877_v30, %v2188_v51  ;;  %v805_v32 = vpop.f32.mrf.mxu0  ;;  %v1108_v35 = vsel %vm1086_vm3, %v1106_v25, %v1107_v19 }
 0x165   : > { %v1035_v41 = vpop.f32.mrf.mxu1  ;;  %1395 = vst.msk [vmem:[%s2239_s10 + $0x20] sm:$0xf] %vm1386_vm5, %v1576_v29  ;;  %v878_v37 = vrot.slane %v805_v32, 1 }
 0x166   : > { %v1109_v38 = vrot.slane %v1035_v41, 2  ;;  %v1152_v42 = vadd.f32 %v1108_v35, %v921_v31  ;;  %v1768_v43 = vpop.f32.mrf.mxu0 }
 0x167   : > { %v1816_v45 = vpop.f32.mrf.mxu1  ;;  %v879_v26 = vsel %vm625_vm2, %v876_v23, %v878_v37 }
 0x168   : > { %v1186_v5 = vadd.f32 %v2220_v27, %v1152_v42  ;;  %v922_v46 = vadd.f32 %v879_v26, %v2191_v59  ;;  %v808_v47 = vpop.f32.mrf.mxu0  ;;  %v1110_v51 = vsel %vm1086_vm3, %v1107_v19, %v1109_v38 }
 0x169   : > { %v1038_v49 = vpop.f32.mrf.mxu1  ;;  %v880_v50 = vrot.slane %v808_v47, 1 }
 0x16a   : > { %v1111_v52 = vrot.slane %v1038_v49, 2  ;;  %vm1204_vm14 = vcmp.ge.f32.partialorder %v1186_v5, 0.0  ;;  %v1222_v48 = vmul.f32 0.2, %v1186_v5  ;;  %v1153_v54 = vadd.f32 %v1110_v51, %v922_v46  ;;  %v1769_v56 = vpop.f32.mrf.mxu0 }
 0x16b   : > { %v1817_v58 = vpop.f32.mrf.mxu1  ;;  %v881_v60 = vsel %vm625_vm2, %v878_v37, %v880_v50 }
 0x16c   : > { %v1240_v0 = vsel %vm1204_vm14, %v1186_v5, %v1222_v48  ;;  %v1187_v55 = vadd.f32 %v2220_v27, %v1153_v54  ;;  %v923_v33 = vadd.f32 %v881_v60, %v2194_v3  ;;  %v813_v1 = vpop.f32.mrf.mxu0  ;;  %v1112_v2 = vsel %vm1086_vm3, %v1109_v38, %v1111_v52 }
 0x16d   : > { %v1043_v59 = vpop.f32.mrf.mxu1  ;;  %v1303_v12 = vmul.f32 %v2223_v34, %v1240_v0  ;;  %v882_v4 = vrot.slane %v813_v1, 1 }
 0x16e   : > { %v1113_v6 = vrot.slane %v1043_v59, 2  ;;  %vm1205_vm15 = vcmp.ge.f32.partialorder %v1187_v55, 0.0  ;;  %v1223_v9 = vmul.f32 0.2, %v1187_v55  ;;  %v1154_v10 = vadd.f32 %v1112_v2, %v923_v33  ;;  %v1772_v13 = vpop.f32.mrf.mxu0 }
 0x16f   : > { %v1820_v14 = vpop.f32.mrf.mxu1  ;;  %v1577_v15 = vpack.c.bf16 %v1303_v12, %v1303_v12  ;;  %v883_v16 = vsel %vm625_vm2, %v880_v50, %v882_v4 }
 0x170   : > { %v1241_v17 = vsel %vm1205_vm15, %v1187_v55, %v1223_v9  ;;  %v1188_v3 = vadd.f32 %v2220_v27, %v1154_v10  ;;  %v924_v21 = vadd.f32 %v883_v16, %v2197_v11  ;;  %v816_v22 = vpop.f32.mrf.mxu0  ;;  %v1114_v19 = vsel %vm1086_vm3, %v1111_v52, %v1113_v6 }
 0x171   : > { %v1046_v34 = vpop.f32.mrf.mxu1  ;;  %1396 = vst.msk [vmem:[%s2239_s10 + $0x24] sm:$0xf] %vm1386_vm5, %v1577_v15  ;;  %v1304_v23 = vmul.f32 %v2234_v63, %v1241_v17  ;;  %v884_v24 = vrot.slane %v816_v22, 1 }
 0x172   : > { %v1115_v62 = vrot.slane %v1046_v34, 2  ;;  %vm1206_vm0 = vcmp.ge.f32.partialorder %v1188_v3, 0.0  ;;  %v1224_v25 = vmul.f32 0.2, %v1188_v3  ;;  %v1155_v29 = vadd.f32 %v1114_v19, %v924_v21  ;;  %v1773_v30 = vpop.f32.mrf.mxu0 }
 0x173   : > { %v1821_v31 = vpop.f32.mrf.mxu1  ;;  %v1578_v32 = vpack.c.bf16 %v1304_v23, %v1304_v23  ;;  %v885_v41 = vsel %vm625_vm2, %v882_v4, %v884_v24 }
 0x174   : > { %v1242_v11 = vsel %vm1206_vm0, %v1188_v3, %v1224_v25  ;;  %v1189_v35 = vadd.f32 %v2220_v27, %v1155_v29  ;;  %v925_v37 = vadd.f32 %v885_v41, %v2200_v20  ;;  %v821_v38 = vpop.f32.mrf.mxu0  ;;  %v1116_v43 = vsel %vm1086_vm3, %v1113_v6, %v1115_v62 }
 0x175   : > { %v1051_v63 = vpop.f32.mrf.mxu1  ;;  %1397 = vst.msk [vmem:[%s2239_s10 + $0x28] sm:$0xf] %vm1386_vm5, %v1578_v32  ;;  %v1305_v42 = vmul.f32 %v2242_v7, %v1242_v11  ;;  %v886_v45 = vrot.slane %v821_v38, 1 }
 0x176   : > { %v1117_v26 = vrot.slane %v1051_v63, 2  ;;  %vm1207_vm1 = vcmp.ge.f32.partialorder %v1189_v35, 0.0  ;;  %v1225_v5 = vmul.f32 0.2, %v1189_v35  ;;  %v1156_v46 = vadd.f32 %v1116_v43, %v925_v37  ;;  %v1776_v47 = vpop.f32.mrf.mxu0 }
 0x177   : > { %v1824_v49 = vpop.f32.mrf.mxu1  ;;  %v1579_v51 = vpack.c.bf16 %v1305_v42, %v1305_v42  ;;  %v887_v50 = vsel %vm625_vm2, %v884_v24, %v886_v45 }
 0x178   : > { %v1243_v20 = vsel %vm1207_vm1, %v1189_v35, %v1225_v5  ;;  %v1190_v52 = vadd.f32 %v2220_v27, %v1156_v46  ;;  %v926_v48 = vadd.f32 %v887_v50, %v2203_v28  ;;  %v824_v54 = vpop.f32.mrf.mxu0  ;;  %v1118_v58 = vsel %vm1086_vm3, %v1115_v62, %v1117_v26 }
 0x179   : > { %v1054_v7 = vpop.f32.mrf.mxu1  ;;  %1398 = vst.msk [vmem:[%s2239_s10 + $0x2c] sm:$0xf] %vm1386_vm5, %v1579_v51  ;;  %v1306_v56 = vmul.f32 %v2257_v40, %v1243_v20  ;;  %v888_v60 = vrot.slane %v824_v54, 1 }
 0x17a   : > { %v1119_v0 = vrot.slane %v1054_v7, 2  ;;  %vm1208_vm4 = vcmp.ge.f32.partialorder %v1190_v52, 0.0  ;;  %v1226_v55 = vmul.f32 0.2, %v1190_v52  ;;  %v1157_v33 = vadd.f32 %v1118_v58, %v926_v48  ;;  %v1777_v1 = vpop.f32.mrf.mxu0 }
 0x17b   : > { %v1825_v59 = vpop.f32.mrf.mxu1  ;;  %v1580_v12 = vpack.c.bf16 %v1306_v56, %v1306_v56  ;;  %v889_v2 = vsel %vm625_vm2, %v886_v45, %v888_v60 }
 0x17c   : > { %v1244_v28 = vsel %vm1208_vm4, %v1190_v52, %v1226_v55  ;;  %v1191_v4 = vadd.f32 %v2220_v27, %v1157_v33  ;;  %v927_v6 = vadd.f32 %v889_v2, %v2206_v36  ;;  %v829_v9 = vpop.f32.mrf.mxu0  ;;  %v1120_v13 = vsel %vm1086_vm3, %v1117_v26, %v1119_v0 }
 0x17d   : > { %v1059_v40 = vpop.f32.mrf.mxu1  ;;  %1399 = vst.msk [vmem:[%s2239_s10 + $0x30] sm:$0xf] %vm1386_vm5, %v1580_v12  ;;  %v1307_v10 = vmul.f32 %v2266_v61, %v1244_v28  ;;  %v890_v14 = vrot.slane %v829_v9, 1 }
 0x17e   : > { %v1121_v15 = vrot.slane %v1059_v40, 2  ;;  %vm1209_vm6 = vcmp.ge.f32.partialorder %v1191_v4, 0.0  ;;  %v1227_v16 = vmul.f32 0.2, %v1191_v4  ;;  %v1158_v17 = vadd.f32 %v1120_v13, %v927_v6  ;;  %v1780_v3 = vpop.f32.mrf.mxu0 }
 0x17f   : > { %v1828_v21 = vpop.f32.mrf.mxu1  ;;  %v1581_v22 = vpack.c.bf16 %v1307_v10, %v1307_v10  ;;  %v891_v34 = vsel %vm625_vm2, %v888_v60, %v890_v14 }
 0x180   : > { %v1245_v36 = vsel %vm1209_vm6, %v1191_v4, %v1227_v16  ;;  %v1192_v23 = vadd.f32 %v2220_v27, %v1158_v17  ;;  %v928_v19 = vadd.f32 %v891_v34, %v2209_v44  ;;  %v832_v24 = vpop.f32.mrf.mxu0  ;;  %v1122_v25 = vsel %vm1086_vm3, %v1119_v0, %v1121_v15 }
 0x181   : > { %v1062_v61 = vpop.f32.mrf.mxu1  ;;  %1400 = vst.msk [vmem:[%s2239_s10 + $0x34] sm:$0xf] %vm1386_vm5, %v1581_v22  ;;  %v1308_v62 = vmul.f32 %v2275_v18, %v1245_v36  ;;  %v892_v29 = vrot.slane %v832_v24, 1 }
 0x182   : > { %v1123_v30 = vrot.slane %v1062_v61, 2  ;;  %vm1210_vm7 = vcmp.ge.f32.partialorder %v1192_v23, 0.0  ;;  %v1228_v31 = vmul.f32 0.2, %v1192_v23  ;;  %v1159_v32 = vadd.f32 %v1122_v25, %v928_v19  ;;  %v1781_v41 = vpop.f32.mrf.mxu0 }
 0x183   : > { %v1829_v11 = vpop.f32.mrf.mxu1  ;;  %v1582_v35 = vpack.c.bf16 %v1308_v62, %v1308_v62  ;;  %v893_v44 = vsel %vm625_vm2, %v890_v14, %v892_v29 }
 0x184   : > { %v1246_v37 = vsel %vm1210_vm7, %v1192_v23, %v1228_v31  ;;  %v1193_v38 = vadd.f32 %v2220_v27, %v1159_v32  ;;  %v929_v63 = vadd.f32 %v893_v44, %v2212_v53  ;;  %v1124_v42 = vsel %vm1086_vm3, %v1121_v15, %v1123_v30 }
 0x185   : > { %1401 = vst.msk [vmem:[%s2239_s10 + $0x38] sm:$0xf] %vm1386_vm5, %v1582_v35  ;;  %v1309_v18 = vmul.f32 %v2284_v39, %v1246_v37 }
 0x186   : > { %vm1211_vm8 = vcmp.ge.f32.partialorder %v1193_v38, 0.0  ;;  %v1229_v43 = vmul.f32 0.2, %v1193_v38  ;;  %v1160_v45 = vadd.f32 %v1124_v42, %v929_v63 }
 0x187   : > { %v1583_v26 = vpack.c.bf16 %v1309_v18, %v1309_v18 }
 0x188   : > { %v1247_v5 = vsel %vm1211_vm8, %v1193_v38, %v1229_v43  ;;  %v1194_v46 = vadd.f32 %v2220_v27, %v1160_v45 }
 0x189   : > { %1402 = vst.msk [vmem:[%s2239_s10 + $0x3c] sm:$0xf] %vm1386_vm5, %v1583_v26  ;;  %v1310_v47 = vmul.f32 %v2293_v57, %v1247_v5 }
 0x18a   : > { %vm1212_vm2 = vcmp.ge.f32.partialorder %v1194_v46, 0.0  ;;  %v1230_v53 = vmul.f32 0.2, %v1194_v46 }
 0x18b   : > { %v1584_v49 = vpack.c.bf16 %v1310_v47, %v1310_v47 }
 0x18c   : > { %v1248_v51 = vsel %vm1212_vm2, %v1194_v46, %v1230_v53 }
 0x18d   : > { %1403 = vst.msk [vmem:[%s2239_s10 + $0x40] sm:$0xf] %vm1386_vm5, %v1584_v49  ;;  %v1311_v39 = vmul.f32 %v2299_v8, %v1248_v51 }
 0x18f   : > { %v1585_v50 = vpack.c.bf16 %v1311_v39, %v1311_v39 }
 0x191   : > { %1404 = vst.msk [vmem:[%s2239_s10 + $0x44] sm:$0xf] %vm1386_vm5, %v1585_v50 }
 0x192 PF: > { %s14_s15 = sadd.s32 1, %s1870_s15  }
 0x193   : > { %p11_p4 = scmp.ge.s32.totalorder %s14_s15, 4  }
 0x195   :  { %13 = sbr.rel (!%p11_p4) target bundleno = 1 (0x1), region = 69 }

// kernel: posterior_forward.4
= control target key start
LH: loop header
LB: loop body
LE: loop exit
PB: predicated region body
PF: predicated region fallthrough
CT: control target
= control target key end

     0   :  { %s1447_s15 = smov 0   ;;  %s1645_s0 = inlined_call_operand.vmem [shape: bf16[4,32,128], index: 0, kind: input, shape index: {}]   ;;  %s1646_s1 = inlined_call_operand.vmem [shape: bf16[4,128,64], index: 1, kind: input, shape index: {}]   ;;  %s1647_s2 = inlined_call_operand.vmem [shape: f32[1,64], index: 2, kind: input, shape index: {}]   ;;  %s1648_s3 = inlined_call_operand.vmem [shape: f32[20,1], index: 3, kind: input, shape index: {}]   ;;  %s1649_s4 = inlined_call_operand.vmem [shape: bf16[4,20,64], index: 4, kind: output, shape index: {}]  }
   0x1 LB: > { %s1107_s16 = sadd.s32 4294967295, %s1419_s15   ;;  %p1111_p0 = scmp.ge.s32.totalorder %s1419_s15, 1  ;;  %s1419_s15 = sphi %s1447_s15, %s14_s15  }
   0x2   : > { %p164_p1 = scmp.lt.s32.totalorder %s1419_s15, 3 }
   0x4   : > { %p165_p2 = pnand %p1111_p0, %p164_p1 }
   0x5   : > { %s1112_s19 = sshll.u32 (!%p165_p2), %s1107_s16, 1 }
   0x6   : > { %168 = sbr.rel (%p165_p2) target bundleno = 369 (0x171), region = 36  ;;  %p193_p3 = scmp.lt.s32.totalorder (!%p165_p2), %s1112_s19, 3 }
   0xb   : > { %v1373_v0 = vld [vmem:[%s1646_s1 + $0x38] sm:$0xff]   ;;  %v1375_v2 = vld [vmem:[%s1646_s1 + $0x30] sm:$0xff]   ;;  %v1377_v4 = vld [vmem:[%s1646_s1 + $0x28] sm:$0xff]   ;;  %v1421_v6 = vmov 0   ;;  %s1651_s19 = smov (!%p193_p3, %s1112_s19), 3  ;;  %vm506_vm0 = vcmask 1046528  }
   0xc   : > { %v1374_v1 = vld [vmem:[%s1646_s1 + $0x78] sm:$0xff]   ;;  %1265 = vmatprep.subr.bf16.mxu0 %v1373_v0  ;;  %v1376_v3 = vld [vmem:[%s1646_s1 + $0x70] sm:$0xff]   ;;  %v1378_v5 = vld [vmem:[%s1646_s1 + $0x68] sm:$0xff]   ;;  %1371 = vset.pattern.permute.xlu0 %v1421_v6  ;;  %s1210_s8 = sshll.u32 %s1651_s19, 4  ;;  %vm667_vm1 = vcmask 1042432   ;;  %vm832_vm2 = vcmask 1041408  }
   0xd   : > { %1289 = vmatprep.subr.bf16.mxu1 %v1374_v1  ;;  %1266 = vmatpush3.bf16.msra.mxu0 %v1373_v0  ;;  %v1379_v7 = vld [vmem:[%s1646_s1 + $0x20] sm:$0xff]   ;;  %v1381_v9 = vld [vmem:[%s1646_s1 + $0x18] sm:$0xff]   ;;  %s1491_s16 = scalar_lea.vmem %s1645_s0, %s1210_s8  ;;  %v1383_v11 = vld [vmem:[%s1646_s1 + $0x10] sm:$0xff]   ;;  %vm914_vm5 = vcmask 523264   ;;  %vm918_vm10 = vcmask 519168   ;;  %s1361_s23 = smul.u32 12, %s1651_s19 }
   0xe   : > { %1290 = vmatpush3.bf16.msra.mxu1 %v1374_v1  ;;  %1267 = vmatprep.subr.bf16.mxu0 %v1375_v2  ;;  %v1380_v8 = vld [vmem:[%s1646_s1 + $0x60] sm:$0xff]   ;;  %v1382_v10 = vld [vmem:[%s1646_s1 + $0x58] sm:$0xff]   ;;  %v1384_v13 = vld [vmem:[%s1646_s1 + $0x50] sm:$0xff]  }
   0xf   : > { %1291 = vmatprep.subr.bf16.mxu1 %v1376_v3  ;;  %1372 = vset.pattern.permute.xlu1 %v1421_v6  ;;  %v1389_v12 = vld [vmem:[%s1491_s16] sm:$0xff]   ;;  %v1385_v14 = vld [vmem:[%s1646_s1 + $0x8] sm:$0xff]   ;;  %v1391_v18 = vld [vmem:[%s1646_s1 + $0xb8] sm:$0xff]   ;;  %s204_s19 = scalar_lea.vmem %s1649_s4, %s1361_s23 }
  0x10   : > { %1281 = vmatprep.mubr.bf16.mxu0 %v1389_v12  ;;  %1305 = vmatprep.mubr.bf16.mxu1 %v1389_v12  ;;  %v1386_v15 = vld [vmem:[%s1646_s1 + $0x48] sm:$0xff]   ;;  %v1387_v16 = vld [vmem:[%s1646_s1] sm:$0xff]   ;;  %v1392_v19 = vld [vmem:[%s1646_s1 + $0xf8] sm:$0xff]  }
  0x11   : > { %1268 = vmatpush3.bf16.msra.mxu0 %v1375_v2  ;;  %v1388_v17 = vld [vmem:[%s1646_s1 + $0x40] sm:$0xff]   ;;  %v1519_v20 = vld [vmem:[%s1491_s16 + $0x8] sm:$0xff]   ;;  %v1393_v21 = vld [vmem:[%s1646_s1 + $0xb0] sm:$0xff]  }
  0x12   : > { %1292 = vmatpush3.bf16.msra.mxu1 %v1376_v3  ;;  %1269 = vmatprep.subr.bf16.mxu0 %v1377_v4  ;;  %v1394_v22 = vld [vmem:[%s1646_s1 + $0xf0] sm:$0xff]   ;;  %v1395_v24 = vld [vmem:[%s1646_s1 + $0xa8] sm:$0xff]   ;;  %v859_v25 = vld [vmem:[%s1648_s3] sm:$0xff] }
  0x13   : > { %1293 = vmatprep.subr.bf16.mxu1 %v1378_v5  ;;  %v1399_v23 = vld [vmem:[%s1491_s16 + $0x10] sm:$0xff]   ;;  %v1396_v27 = vld [vmem:[%s1646_s1 + $0xe8] sm:$0xff]   ;;  %895 = vperm.xlu0 %1371, %v859_v25   ;;  %v1400_v28 = vld [vmem:[%s1491_s16 + $0x18] sm:$0xff]  }
  0x14   : > { %v861_v26 = vld [vmem:[%s1648_s3 + $0x10] sm:$0xf]  ;;  %v860_v29 = vld [vmem:[%s1648_s3 + $0x8] sm:$0xff]  ;;  %v1397_v30 = vld [vmem:[%s1646_s1 + $0xa0] sm:$0xff]  }
  0x15   : > { %1270 = vmatpush3.bf16.msra.mxu0 %v1377_v4  ;;  %905 = vperm.xlu1 %1372, %v861_v26   ;;  %v1398_v31 = vld [vmem:[%s1646_s1 + $0xe0] sm:$0xff]   ;;  %v1401_v32 = vld [vmem:[%s1646_s1 + $0x98] sm:$0xff]   ;;  %v1403_v34 = vld [vmem:[%s1646_s1 + $0x90] sm:$0xff]  }
  0x16   : > { %1294 = vmatpush3.bf16.msra.mxu1 %v1378_v5  ;;  %1271 = vmatprep.subr.bf16.mxu0 %v1379_v7  ;;  %v1402_v33 = vld [vmem:[%s1646_s1 + $0xd8] sm:$0xff]   ;;  %v1404_v35 = vld [vmem:[%s1646_s1 + $0xd0] sm:$0xff]   ;;  %v1405_v36 = vld [vmem:[%s1646_s1 + $0x88] sm:$0xff]  }
  0x17   : > { %1295 = vmatprep.subr.bf16.mxu1 %v1380_v8  ;;  %900 = vperm.xlu0 %1371, %v860_v29   ;;  %v1406_v37 = vld [vmem:[%s1646_s1 + $0xc8] sm:$0xff]   ;;  %v1407_v38 = vld [vmem:[%s1646_s1 + $0x80] sm:$0xff]  }
  0x18   : > { %v1408_v39 = vld [vmem:[%s1646_s1 + $0xc0] sm:$0xff]  }
  0x19   : > { %1272 = vmatpush3.bf16.msra.mxu0 %v1379_v7 }
  0x1a   : > { %1296 = vmatpush3.bf16.msra.mxu1 %v1380_v8  ;;  %1273 = vmatprep.subr.bf16.mxu0 %v1381_v9 }
  0x1b   : > { %1297 = vmatprep.subr.bf16.mxu1 %v1382_v10 }
  0x1d   : > { %1274 = vmatpush3.bf16.msra.mxu0 %v1381_v9 }
  0x1e   : > { %1298 = vmatpush3.bf16.msra.mxu1 %v1382_v10  ;;  %1275 = vmatprep.subr.bf16.mxu0 %v1383_v11 }
  0x1f   : > { %1299 = vmatprep.subr.bf16.mxu1 %v1384_v13 }
  0x21   : > { %1276 = vmatpush3.bf16.msra.mxu0 %v1383_v11 }
  0x22   : > { %1300 = vmatpush3.bf16.msra.mxu1 %v1384_v13  ;;  %1277 = vmatprep.subr.bf16.mxu0 %v1385_v14 }
  0x23   : > { %1301 = vmatprep.subr.bf16.mxu1 %v1386_v15 }
  0x25   : > { %1278 = vmatpush3.bf16.msra.mxu0 %v1385_v14 }
  0x26   : > { %1302 = vmatpush3.bf16.msra.mxu1 %v1386_v15  ;;  %1279 = vmatprep.subr.bf16.mxu0 %v1387_v16 }
  0x27   : > { %1303 = vmatprep.subr.bf16.mxu1 %v1388_v17 }
  0x29   : > { %1280 = vmatpush3.bf16.msra.mxu0 %v1387_v16 }
  0x2a   : > { %1304 = vmatpush3.bf16.msra.mxu1 %v1388_v17  ;;  %1313 = vmatprep.subr.bf16.mxu0 %v1391_v18 }
  0x2b   : > { %1337 = vmatprep.subr.bf16.mxu1 %v1392_v19 }
  0x2c   : > { %1282 = vmatmul.mubr.bf16.vlgmr.msra.gmra.mxu0 %v1519_v20 }
  0x2d   : > { %1306 = vmatmul.mubr.bf16.vlgmr.msra.gmra.mxu1 %v1519_v20  ;;  %1314 = vmatpush3.bf16.msra.mxu0 %v1391_v18 }
  0x2e   : > { %1338 = vmatpush3.bf16.msra.mxu1 %v1392_v19  ;;  %1315 = vmatprep.subr.bf16.mxu0 %v1393_v21 }
  0x2f   : > { %1339 = vmatprep.subr.bf16.mxu1 %v1394_v22  ;;  %1309 = vmatprep.mubr.bf16.mxu1 %v1399_v23 }
  0x30   : > { %1285 = vmatprep.mubr.bf16.mxu0 %v1399_v23 }
  0x31   : > { %1316 = vmatpush3.bf16.msra.mxu0 %v1393_v21 }
  0x32   : > { %1340 = vmatpush3.bf16.msra.mxu1 %v1394_v22  ;;  %1317 = vmatprep.subr.bf16.mxu0 %v1395_v24 }
  0x33   : > { %1341 = vmatprep.subr.bf16.mxu1 %v1396_v27 }
  0x34   : > { %1286 = vmatmul.mubr.bf16.gmra.mxu0 %v1400_v28 }
  0x35   : > { %1318 = vmatpush3.bf16.msra.mxu0 %v1395_v24  ;;  %1310 = vmatmul.mubr.bf16.gmra.mxu1 %v1400_v28  ;;  %v1201_v24 = vld [vmem:[%s1647_s2] ss:$0 sm:$0xff] }
  0x36   : > { %1342 = vmatpush3.bf16.msra.mxu1 %v1396_v27  ;;  %1319 = vmatprep.subr.bf16.mxu0 %v1397_v30 }
  0x37   : > { %1343 = vmatprep.subr.bf16.mxu1 %v1398_v31  ;;  %1329 = vmatprep.mubr.bf16.mxu0 %v1389_v12 }
  0x38   : > { %1353 = vmatprep.mubr.bf16.mxu1 %v1389_v12 }
  0x39   : > { %1320 = vmatpush3.bf16.msra.mxu0 %v1397_v30 }
  0x3a   : > { %1344 = vmatpush3.bf16.msra.mxu1 %v1398_v31  ;;  %1321 = vmatprep.subr.bf16.mxu0 %v1401_v32 }
  0x3b   : > { %1345 = vmatprep.subr.bf16.mxu1 %v1402_v33 }
  0x3d   : > { %1322 = vmatpush3.bf16.msra.mxu0 %v1401_v32 }
  0x3e   : > { %1346 = vmatpush3.bf16.msra.mxu1 %v1402_v33  ;;  %1323 = vmatprep.subr.bf16.mxu0 %v1403_v34 }
  0x3f   : > { %1347 = vmatprep.subr.bf16.mxu1 %v1404_v35 }
  0x41   : > { %1324 = vmatpush3.bf16.msra.mxu0 %v1403_v34 }
  0x42   : > { %1348 = vmatpush3.bf16.msra.mxu1 %v1404_v35  ;;  %1325 = vmatprep.subr.bf16.mxu0 %v1405_v36 }
  0x43   : > { %1349 = vmatprep.subr.bf16.mxu1 %v1406_v37 }
  0x45   : > { %1326 = vmatpush3.bf16.msra.mxu0 %v1405_v36 }
  0x46   : > { %1350 = vmatpush3.bf16.msra.mxu1 %v1406_v37  ;;  %1327 = vmatprep.subr.bf16.mxu0 %v1407_v38 }
  0x47   : > { %1351 = vmatprep.subr.bf16.mxu1 %v1408_v39 }
  0x49   : > { %1328 = vmatpush3.bf16.msra.mxu0 %v1407_v38 }
  0x4a   : > { %1352 = vmatpush3.bf16.msra.mxu1 %v1408_v39 }
  0x4c   : > { %1330 = vmatmul.mubr.bf16.vlgmr.msra.gmra.mxu0 %v1519_v20 }
  0x4d   : > { %1354 = vmatmul.mubr.bf16.vlgmr.msra.gmra.mxu1 %v1519_v20  ;;  %1333 = vmatprep.mubr.bf16.mxu0 %v1399_v23 }
  0x4e   : > { %1357 = vmatprep.mubr.bf16.mxu1 %v1399_v23 }
  0x54   : > { %1334 = vmatmul.mubr.bf16.gmra.mxu0 %v1400_v28 }
  0x55   : > { %1358 = vmatmul.mubr.bf16.gmra.mxu1 %v1400_v28 }
  0xec   : > { %v1283_v40 = vpop.f32.mrf.mxu0 }
  0xed   : > { %v1307_v41 = vpop.f32.mrf.mxu1 }
  0xee   : > { %v337_v42 = vpop.f32.mrf.mxu0  ;;  %v510_v60 = vrot.slane %v1307_v41, 1 }
  0xef   : > { %v471_v43 = vpop.f32.mrf.mxu1 }
  0xf0   : > { %v1284_v44 = vpop.f32.mrf.mxu0  ;;  %v507_v58 = vrot.slane %v471_v43, 1  ;;  %v525_v7 = vadd.f32 %v1283_v40, %v510_v60 }
  0xf1   : > { %v1308_v45 = vpop.f32.mrf.mxu1 }
  0xf2   : > { %v340_v46 = vpop.f32.mrf.mxu0 }
  0xf3   : > { %v474_v47 = vpop.f32.mrf.mxu1 }
  0xf4   : > { %v1287_v48 = vpop.f32.mrf.mxu0  ;;  %v508_v55 = vrot.slane %v474_v47, 1 }
  0xf5   : > { %v1311_v49 = vpop.f32.mrf.mxu1 }
  0xf6   : > { %v352_v50 = vpop.f32.mrf.mxu0  ;;  %v509_v62 = vsel %vm506_vm0, %v507_v58, %v508_v55  ;;  %v511_v3 = vsel %vm506_vm0, %v508_v55, %v510_v60  ;;  %v515_v9 = vrot.slane %v1311_v49, 1  ;;  %v1592_v60 = vpop.permute.xlu0 %895 }
  0xf7   : > { %v486_v51 = vpop.f32.mrf.mxu1  ;;  %v523_v8 = vadd.f32 %v509_v62, %v337_v42  ;;  %v524_v17 = vadd.f32 %v511_v3, %v340_v46 }
  0xf8   : > { %v1288_v52 = vpop.f32.mrf.mxu0  ;;  %v512_v0 = vrot.slane %v486_v51, 1  ;;  %v528_v33 = vadd.f32 %v1287_v48, %v515_v9 }
  0xf9   : > { %v1312_v53 = vpop.f32.mrf.mxu1 }
  0xfa   : > { %v355_v54 = vpop.f32.mrf.mxu0 }
  0xfb   : > { %v489_v56 = vpop.f32.mrf.mxu1 }
  0xfc   : > { %v513_v1 = vrot.slane %v489_v56, 1 }
  0xfe   : > { %v514_v18 = vsel %vm506_vm0, %v512_v0, %v513_v1  ;;  %v516_v28 = vsel %vm506_vm0, %v513_v1, %v515_v9 }
  0xff   : > { %v526_v37 = vadd.f32 %v514_v18, %v352_v50  ;;  %v527_v42 = vadd.f32 %v516_v28, %v355_v54 }
 0x10c   : > { %v1331_v57 = vpop.f32.mrf.mxu0 }
 0x10d   : > { %v1355_v59 = vpop.f32.mrf.mxu1  ;;  %v671_v4 = vrot.slane %v1331_v57, 5 }
 0x10e   : > { %v628_v61 = vpop.f32.mrf.mxu0  ;;  %v836_v12 = vrot.slane %v1355_v59, 6 }
 0x10f   : > { %v793_v63 = vpop.f32.mrf.mxu1  ;;  %v668_v13 = vrot.slane %v628_v61, 5 }
 0x110   : > { %v1332_v2 = vpop.f32.mrf.mxu0  ;;  %v833_v22 = vrot.slane %v793_v63, 6 }
 0x111   : > { %v673_v5 = vrot.slane %v1332_v2, 5  ;;  %v1356_v6 = vpop.f32.mrf.mxu1 }
 0x112   : > { %v838_v10 = vrot.slane %v1356_v6, 6  ;;  %v631_v11 = vpop.f32.mrf.mxu0 }
 0x113   : > { %v674_v14 = vsel %vm667_vm1, %v671_v4, %v673_v5  ;;  %v669_v15 = vrot.slane %v631_v11, 5  ;;  %v796_v16 = vpop.f32.mrf.mxu1 }
 0x114   : > { %v690_v19 = vadd.f32 %v674_v14, %v525_v7  ;;  %v834_v20 = vrot.slane %v796_v16, 6  ;;  %v1335_v21 = vpop.f32.mrf.mxu0  ;;  %v839_v23 = vsel %vm832_vm2, %v836_v12, %v838_v10  ;;  %v1603_v16 = vpop.permute.xlu0 %900 }
 0x115   : > { %v670_v25 = vsel %vm667_vm1, %v668_v13, %v669_v15  ;;  %v672_v26 = vsel %vm667_vm1, %v669_v15, %v671_v4  ;;  %v1359_v27 = vpop.f32.mrf.mxu1  ;;  %v678_v43 = vrot.slane %v1335_v21, 5  ;;  %v1601_v15 = vpop.permute.xlu1 %905 }
 0x116   : > { %v855_v29 = vadd.f32 %v839_v23, %v690_v19  ;;  %v688_v30 = vadd.f32 %v670_v25, %v523_v8  ;;  %v689_v31 = vadd.f32 %v672_v26, %v524_v17  ;;  %v644_v32 = vpop.f32.mrf.mxu0  ;;  %v835_v34 = vsel %vm832_vm2, %v833_v22, %v834_v20 }
 0x117   : > { %v837_v35 = vsel %vm832_vm2, %v834_v20, %v836_v12  ;;  %v809_v36 = vpop.f32.mrf.mxu1  ;;  %v843_v44 = vrot.slane %v1359_v27, 6  ;;  %v675_v49 = vrot.slane %v644_v32, 5 }
 0x118   : > { %v871_v38 = vadd.f32 %v1201_v24, %v855_v29  ;;  %v853_v39 = vadd.f32 %v835_v34, %v688_v30  ;;  %v854_v40 = vadd.f32 %v837_v35, %v689_v31  ;;  %v1336_v41 = vpop.f32.mrf.mxu0  ;;  %v840_v51 = vrot.slane %v809_v36, 6 }
 0x119   : > { %v680_v45 = vrot.slane %v1336_v41, 5  ;;  %v1360_v46 = vpop.f32.mrf.mxu1 }
 0x11a   : > { %v869_v47 = vadd.f32 %v1201_v24, %v853_v39  ;;  %v845_v52 = vrot.slane %v1360_v46, 6  ;;  %v647_v48 = vpop.f32.mrf.mxu0  ;;  %v883_v53 = vmul.f32 0.2, %v871_v38  ;;  %v870_v55 = vadd.f32 %v1201_v24, %v854_v40 }
 0x11b   : > { %v681_v56 = vsel %vm667_vm1, %v678_v43, %v680_v45  ;;  %v676_v57 = vrot.slane %v647_v48, 5  ;;  %v812_v50 = vpop.f32.mrf.mxu1  ;;  %vm877_vm4 = vcmp.ge.f32.partialorder %v871_v38, 0.0 }
 0x11c   : > { %vm875_vm3 = vcmp.ge.f32.partialorder %v869_v47, 0.0  ;;  %v881_v58 = vmul.f32 0.2, %v869_v47  ;;  %v693_v59 = vadd.f32 %v681_v56, %v528_v33  ;;  %v846_v54 = vsel %vm832_vm2, %v843_v44, %v845_v52 }
 0x11d   : > { %v677_v61 = vsel %vm667_vm1, %v675_v49, %v676_v57  ;;  %v679_v62 = vsel %vm667_vm1, %v676_v57, %v678_v43  ;;  %v841_v63 = vrot.slane %v812_v50, 6  ;;  %v882_v4 = vmul.f32 0.2, %v870_v55 }
 0x11e   : > { %v887_v0 = vsel %vm875_vm3, %v869_v47, %v881_v58  ;;  %v858_v1 = vadd.f32 %v846_v54, %v693_v59  ;;  %v691_v2 = vadd.f32 %v677_v61, %v526_v37  ;;  %v692_v3 = vadd.f32 %v679_v62, %v527_v42 }
 0x11f   : > { %v842_v5 = vsel %vm832_vm2, %v840_v51, %v841_v63  ;;  %v844_v6 = vsel %vm832_vm2, %v841_v63, %v843_v44  ;;  %v908_v10 = vmul.f32 %v1592_v60, %v887_v0  ;;  %v889_v11 = vsel %vm877_vm4, %v871_v38, %v883_v53 }
 0x120   : > { %v874_v7 = vadd.f32 %v1201_v24, %v858_v1  ;;  %v856_v8 = vadd.f32 %v842_v5, %v691_v2  ;;  %v857_v9 = vadd.f32 %v844_v6, %v692_v3  ;;  %vm876_vm6 = vcmp.ge.f32.partialorder %v870_v55, 0.0 }
 0x121   : > { %v888_v17 = vsel %vm876_vm6, %v870_v55, %v882_v4  ;;  %v910_v21 = vmul.f32 %v1601_v15, %v889_v11  ;;  %v915_v23 = vsel %vm914_vm5, %v908_v10, 0.0  ;;  %vm1044_vm1 = vcmask 517120  }
 0x122   : > { %v886_v12 = vmul.f32 0.2, %v874_v7  ;;  %v872_v13 = vadd.f32 %v1201_v24, %v856_v8  ;;  %v873_v14 = vadd.f32 %v1201_v24, %v857_v9  ;;  %vm880_vm7 = vcmp.ge.f32.partialorder %v874_v7, 0.0 }
 0x123   : > { %v909_v22 = vmul.f32 %v1603_v16, %v888_v17  ;;  %v919_v31 = vsel %vm918_vm10, %v910_v21, 0.0 }
 0x124   : > { %vm878_vm8 = vcmp.ge.f32.partialorder %v872_v13, 0.0  ;;  %v884_v18 = vmul.f32 0.2, %v872_v13  ;;  %v885_v19 = vmul.f32 0.2, %v873_v14  ;;  %v892_v20 = vsel %vm880_vm7, %v874_v7, %v886_v12 }
 0x125   : > { %vm879_vm9 = vcmp.ge.f32.partialorder %v873_v14, 0.0  ;;  %v913_v27 = vmul.f32 %v1601_v15, %v892_v20  ;;  %v916_v29 = vsel %vm914_vm5, %v909_v22, 0.0 }
 0x126   : > { %v890_v25 = vsel %vm878_vm8, %v872_v13, %v884_v18  ;;  %v891_v24 = vsel %vm879_vm9, %v873_v14, %v885_v19  ;;  %v917_v30 = vadd.f32 %v916_v29, %v915_v23 }
 0x127   : > { %v911_v26 = vmul.f32 %v1592_v60, %v890_v25  ;;  %v912_v28 = vmul.f32 %v1603_v16, %v891_v24  ;;  %v930_v36 = vsel %vm918_vm10, %v913_v27, 0.0 }
 0x128   : > { %v920_v34 = vadd.f32 %v919_v31, %v917_v30 }
 0x129   : > { %v927_v32 = vsel %vm914_vm5, %v911_v26, 0.0  ;;  %v928_v33 = vsel %vm914_vm5, %v912_v28, 0.0 }
 0x12a   : > { %v929_v35 = vadd.f32 %v928_v33, %v927_v32  ;;  %v921_v37 = vrot.slane %v920_v34, 4 }
 0x12c   : > { %v931_v38 = vadd.f32 %v930_v36, %v929_v35  ;;  %v922_v39 = vadd.f32 %v921_v37, %v920_v34 }
 0x12e   : > { %v932_v40 = vrot.slane %v931_v38, 4  ;;  %v923_v41 = vrot.slane %v922_v39, 2 }
 0x130   : > { %v933_v42 = vadd.f32 %v932_v40, %v931_v38  ;;  %v924_v43 = vadd.f32 %v923_v41, %v922_v39 }
 0x132   : > { %v934_v44 = vrot.slane %v933_v42, 2  ;;  %v925_v45 = vrot.slane %v924_v43, 1 }
 0x134   : > { %v935_v46 = vadd.f32 %v934_v44, %v933_v42  ;;  %v926_v47 = vadd.f32 %v925_v45, %v924_v43 }
 0x136   : > { %v936_v49 = vrot.slane %v935_v46, 1  ;;  %v938_v52 = vmul.f32 0.0625, %v926_v47 }
 0x138   : > { %v937_v51 = vadd.f32 %v936_v49, %v935_v46  ;;  %v940_v53 = vsub.f32 %v887_v0, %v938_v52  ;;  %v941_v55 = vsub.f32 %v888_v17, %v938_v52  ;;  %v942_v56 = vsub.f32 %v889_v11, %v938_v52 }
 0x13a   : > { %v939_v48 = vmul.f32 0.0625, %v937_v51  ;;  %v946_v59 = vmul.f32 %v940_v53, %v940_v53  ;;  %v947_v54 = vmul.f32 %v941_v55, %v941_v55  ;;  %v948_v61 = vmul.f32 %v942_v56, %v942_v56 }
 0x13c   : > { %v943_v57 = vsub.f32 %v890_v25, %v939_v48  ;;  %v944_v50 = vsub.f32 %v891_v24, %v939_v48  ;;  %v945_v58 = vsub.f32 %v892_v20, %v939_v48  ;;  %v952_v2 = vmul.f32 %v946_v59, %v1592_v60 }
 0x13d   : > { %v953_v3 = vmul.f32 %v947_v54, %v1603_v16  ;;  %v954_v4 = vmul.f32 %v948_v61, %v1601_v15 }
 0x13e   : > { %v949_v62 = vmul.f32 %v943_v57, %v943_v57  ;;  %v950_v63 = vmul.f32 %v944_v50, %v944_v50  ;;  %v951_v1 = vmul.f32 %v945_v58, %v945_v58  ;;  %v958_v7 = vsel %vm914_vm5, %v952_v2, 0.0 }
 0x13f   : > { %v959_v8 = vsel %vm914_vm5, %v953_v3, 0.0  ;;  %v961_v12 = vsel %vm918_vm10, %v954_v4, 0.0 }
 0x140   : > { %v955_v5 = vmul.f32 %v949_v62, %v1592_v60  ;;  %v956_v0 = vmul.f32 %v950_v63, %v1603_v16  ;;  %v957_v6 = vmul.f32 %v951_v1, %v1601_v15  ;;  %v960_v9 = vadd.f32 %v959_v8, %v958_v7 }
 0x142   : > { %v969_v10 = vsel %vm914_vm5, %v955_v5, 0.0  ;;  %v970_v11 = vsel %vm914_vm5, %v956_v0, 0.0  ;;  %v962_v14 = vadd.f32 %v961_v12, %v960_v9  ;;  %v972_v17 = vsel %vm918_vm10, %v957_v6, 0.0 }
 0x143   : > { %v971_v13 = vadd.f32 %v970_v11, %v969_v10 }
 0x144   : > { %v963_v19 = vrot.slane %v962_v14, 4 }
 0x145   : > { %v973_v18 = vadd.f32 %v972_v17, %v971_v13 }
 0x146   : > { %v964_v21 = vadd.f32 %v963_v19, %v962_v14 }
 0x147   : > { %v974_v20 = vrot.slane %v973_v18, 4 }
 0x148   : > { %v965_v23 = vrot.slane %v964_v21, 2 }
 0x149   : > { %v975_v22 = vadd.f32 %v974_v20, %v973_v18 }
 0x14a   : > { %v966_v24 = vadd.f32 %v965_v23, %v964_v21 }
 0x14b   : > { %v976_v25 = vrot.slane %v975_v22, 2 }
 0x14c   : > { %v967_v27 = vrot.slane %v966_v24, 1 }
 0x14d   : > { %v977_v26 = vadd.f32 %v976_v25, %v975_v22 }
 0x14e   : > { %v968_v29 = vadd.f32 %v967_v27, %v966_v24 }
 0x14f   : > { %v978_v28 = vrot.slane %v977_v26, 1 }
 0x150   : > { %v980_v31 = vmul.f32 0.0625, %v968_v29 }
 0x151   : > { %v979_v30 = vadd.f32 %v978_v28, %v977_v26 }
 0x152   : > { %v982_v33 = vadd.f32 1e-06, %v980_v31 }
 0x153   : > { %v981_v32 = vmul.f32 0.0625, %v979_v30 }
 0x154   : > { %1409 = vrsqrt.f32 %v982_v33 }
 0x155   : > { %v983_v34 = vadd.f32 1e-06, %v981_v32 }
 0x157   : > { %1411 = vrsqrt.f32 %v983_v34 }
 0x161   : > { %v1410_v35 = vpop.eup %1409 }
 0x162   : > { %v986_v37 = vmul.f32 %v1410_v35, %v940_v53  ;;  %v987_v38 = vmul.f32 %v1410_v35, %v941_v55  ;;  %v988_v39 = vmul.f32 %v1410_v35, %v942_v56 }
 0x164   : > { %v1412_v36 = vpop.eup %1411  ;;  %vm992_vm11 = vcmp.ge.f32.partialorder %v986_v37, 0.0  ;;  %vm993_vm12 = vcmp.ge.f32.partialorder %v987_v38, 0.0  ;;  %vm994_vm13 = vcmp.ge.f32.partialorder %v988_v39, 0.0  ;;  %v998_v43 = vmul.f32 0.2, %v986_v37 }
 0x165   : > { %v989_v40 = vmul.f32 %v1412_v36, %v943_v57  ;;  %v990_v41 = vmul.f32 %v1412_v36, %v944_v50  ;;  %v991_v42 = vmul.f32 %v1412_v36, %v945_v58  ;;  %v999_v44 = vmul.f32 0.2, %v987_v38 }
 0x166   : > { %v1000_v45 = vmul.f32 0.2, %v988_v39  ;;  %v1004_v49 = vsel %vm992_vm11, %v986_v37, %v998_v43 }
 0x167   : > { %vm995_vm14 = vcmp.ge.f32.partialorder %v989_v40, 0.0  ;;  %vm996_vm15 = vcmp.ge.f32.partialorder %v990_v41, 0.0  ;;  %vm997_vm0 = vcmp.ge.f32.partialorder %v991_v42, 0.0  ;;  %v1001_v46 = vmul.f32 0.2, %v989_v40 }
 0x168   : > { %v1002_v47 = vmul.f32 0.2, %v990_v41  ;;  %v1003_v51 = vmul.f32 0.2, %v991_v42  ;;  %v1005_v52 = vsel %vm993_vm12, %v987_v38, %v999_v44  ;;  %v1010_v48 = vmul.f32 %v1004_v49, %v1592_v60 }
 0x169   : > { %v1006_v53 = vsel %vm994_vm13, %v988_v39, %v1000_v45  ;;  %v1007_v55 = vsel %vm995_vm14, %v989_v40, %v1001_v46  ;;  %v1011_v57 = vmul.f32 %v1005_v52, %v1603_v16 }
 0x16a   : > { %v1008_v56 = vsel %vm996_vm15, %v990_v41, %v1002_v47  ;;  %v1009_v50 = vsel %vm997_vm0, %v991_v42, %v1003_v51  ;;  %v1012_v58 = vmul.f32 %v1006_v53, %v1601_v15  ;;  %v1013_v59 = vmul.f32 %v1007_v55, %v1592_v60 }
 0x16b   : > { %v1014_v54 = vmul.f32 %v1008_v56, %v1603_v16  ;;  %v1015_v61 = vmul.f32 %v1009_v50, %v1601_v15  ;;  %v1211_v62 = vpack.c.bf16 %v1010_v48, %v1010_v48  ;;  %v1212_v63 = vpack.c.bf16 %v1011_v57, %v1011_v57 }
 0x16c   : > { %v1213_v1 = vpack.c.bf16 %v1012_v58, %v1012_v58  ;;  %v1214_v2 = vpack.c.bf16 %v1013_v59, %v1013_v59 }
 0x16d   : > { %v1215_v3 = vpack.c.bf16 %v1014_v54, %v1014_v54  ;;  %v1216_v4 = vpack.c.bf16 %v1015_v61, %v1015_v61  ;;  %1042 = vst.msk [vmem:[%s204_s19] sm:$0xf] %vm918_vm10, %v1211_v62  ;;  %1043 = vst.msk [vmem:[%s204_s19 + $0x4] sm:$0xf] %vm918_vm10, %v1212_v63 }
 0x16e   : > { %1045 = vst.msk [vmem:[%s204_s19 + $0x8] sm:$0x3] %vm1044_vm1, %v1213_v1 }
 0x16f   : > { %1046 = vst.msk [vmem:[%s204_s19 + $0xc] sm:$0xf] %vm918_vm10, %v1214_v2  ;;  %1047 = vst.msk [vmem:[%s204_s19 + $0x10] sm:$0xf] %vm918_vm10, %v1215_v3 }
 0x170   : > { %1048 = vst.msk [vmem:[%s204_s19 + $0x14] sm:$0x3] %vm1044_vm1, %v1216_v4 }
 0x171 PF: > { %s14_s15 = sadd.s32 1, %s1419_s15  }
 0x172   : > { %p11_p4 = scmp.ge.s32.totalorder %s14_s15, 4  }
 0x174   :  { %13 = sbr.rel (!%p11_p4) target bundleno = 1 (0x1), region = 69 }

// kernel: posterior_forward.5
= control target key start
LH: loop header
LB: loop body
LE: loop exit
PB: predicated region body
PF: predicated region fallthrough
CT: control target
= control target key end

     0   :  { %s1773_s21 = smov 0   ;;  %s2075_s0 = inlined_call_operand.vmem [shape: bf16[4,16,256], index: 0, kind: input, shape index: {}]   ;;  %s2076_s1 = inlined_call_operand.vmem [shape: bf16[4,256,128], index: 1, kind: input, shape index: {}]   ;;  %s2077_s2 = inlined_call_operand.vmem [shape: f32[1,128], index: 2, kind: input, shape index: {}]   ;;  %s2078_s3 = inlined_call_operand.vmem [shape: f32[6,1], index: 3, kind: input, shape index: {}]   ;;  %s2079_s4 = inlined_call_operand.vmem [shape: f32[128,128], index: 4, kind: input, shape index: {}]   ;;  %s2080_s5 = inlined_call_operand.vmem [shape: f32[1,128], index: 5, kind: input, shape index: {}]   ;;  %s2081_s6 = inlined_call_operand.vmem [shape: f32[4,1,128], index: 6, kind: output, shape index: {}]  }
   0x1 LB: > { %s1295_s22 = sadd.s32 4294967295, %s1732_s21   ;;  %p1299_p0 = scmp.ge.s32.totalorder %s1732_s21, 1  ;;  %s1732_s21 = sphi %s1773_s21, %s16_s21  }
   0x2   : > { %p214_p1 = scmp.lt.s32.totalorder %s1732_s21, 3 }
   0x4   : > { %p215_p2 = pnand %p1299_p0, %p214_p1 }
   0x5   : > { %s1300_s9 = sshll.u32 (!%p215_p2), %s1295_s22, 1 }
   0x6   : > { %218 = sbr.rel (%p215_p2) target bundleno = 575 (0x23f), region = 44  ;;  %p245_p3 = scmp.lt.s32.totalorder (!%p215_p2), %s1300_s9, 3 }
   0xb   : > { %v1652_v0 = vld [vmem:[%s2076_s1 + $0x78] sm:$0xff]   ;;  %v1734_v4 = vmov 0   ;;  %v1656_v5 = vld [vmem:[%s2076_s1 + $0x70] sm:$0xff]   ;;  %v1660_v9 = vld [vmem:[%s2076_s1 + $0x68] sm:$0xff]   ;;  %s2083_s9 = smov (!%p245_p3, %s1300_s9), 3  ;;  %vm1736_vm0 = vmmov 0  }
   0xc   : > { %v1653_v1 = vld [vmem:[%s2076_s1 + $0xf8] sm:$0xff]   ;;  %1475 = vmatprep.subr.bf16.mxu0 %v1652_v0  ;;  %1651 = vset.pattern.permute.xlu0 %v1734_v4  ;;  %v1657_v6 = vld [vmem:[%s2076_s1 + $0xf0] sm:$0xff]   ;;  %v1661_v10 = vld [vmem:[%s2076_s1 + $0xe8] sm:$0xff]   ;;  %s1474_s10 = sshll.u32 %s2083_s9, 4  ;;  %vm824_vm1 = vcmask 1044480   ;;  %vm1017_vm2 = vcmask 1043456   ;;  %s254_s19 = scalar_lea.vmem %s2081_s6, %s2083_s9 }
   0xd   : > { %v1654_v2 = vld [vmem:[%s2076_s1 + $0x38] sm:$0xff]   ;;  %1503 = vmatprep.subr.bf16.mxu1 %v1653_v1  ;;  %v1658_v7 = vld [vmem:[%s2076_s1 + $0x30] sm:$0xff]   ;;  %v1662_v11 = vld [vmem:[%s2076_s1 + $0x28] sm:$0xff]   ;;  %s1879_s18 = scalar_lea.vmem %s2075_s0, %s1474_s10  ;;  %vm1051_vm4 = vcmask 1045504   ;;  %vm1145_vm8 = vcmask 1041409  }
   0xe   : > { %v1655_v3 = vld [vmem:[%s2076_s1 + $0xb8] sm:$0xff]   ;;  %1476 = vmatpush3.bf16.msra.mxu0 %v1654_v2  ;;  %v1659_v8 = vld [vmem:[%s2076_s1 + $0xb0] sm:$0xff]   ;;  %v1663_v12 = vld [vmem:[%s2076_s1 + $0xa8] sm:$0xff]  }
   0xf   : > { %1504 = vmatpush3.bf16.msra.mxu1 %v1655_v3  ;;  %1477 = vmatprep.subr.bf16.mxu0 %v1656_v5  ;;  %v1664_v13 = vld [vmem:[%s2076_s1 + $0x60] sm:$0xff]   ;;  %v1668_v17 = vld [vmem:[%s2076_s1 + $0x58] sm:$0xff]   ;;  %v1672_v21 = vld [vmem:[%s2076_s1 + $0x50] sm:$0xff]  }
  0x10   : > { %1505 = vmatprep.subr.bf16.mxu1 %v1657_v6  ;;  %v1665_v14 = vld [vmem:[%s2076_s1 + $0xe0] sm:$0xff]   ;;  %v1669_v18 = vld [vmem:[%s2076_s1 + $0xd8] sm:$0xff]   ;;  %v1673_v22 = vld [vmem:[%s2076_s1 + $0xd0] sm:$0xff]   ;;  %v1735_v6 = vmov 0.0  }
  0x11   : > { %v1666_v15 = vld [vmem:[%s2076_s1 + $0x20] sm:$0xff]   ;;  %v1670_v19 = vld [vmem:[%s2076_s1 + $0x18] sm:$0xff]   ;;  %v1674_v23 = vld [vmem:[%s2076_s1 + $0x10] sm:$0xff]  }
  0x12   : > { %1478 = vmatpush3.bf16.msra.mxu0 %v1658_v7  ;;  %v1667_v16 = vld [vmem:[%s2076_s1 + $0xa0] sm:$0xff]   ;;  %v1671_v20 = vld [vmem:[%s2076_s1 + $0x98] sm:$0xff]   ;;  %v1675_v24 = vld [vmem:[%s2076_s1 + $0x90] sm:$0xff]  }
  0x13   : > { %1506 = vmatpush3.bf16.msra.mxu1 %v1659_v8  ;;  %1479 = vmatprep.subr.bf16.mxu0 %v1660_v9  ;;  %v1676_v25 = vld [vmem:[%s2076_s1 + $0x48] sm:$0xff]   ;;  %v1680_v29 = vld [vmem:[%s2076_s1 + $0x40] sm:$0xff]   ;;  %v1687_v35 = vld [vmem:[%s2076_s1 + $0x178] sm:$0xff]  }
  0x14   : > { %1507 = vmatprep.subr.bf16.mxu1 %v1661_v10  ;;  %v1677_v26 = vld [vmem:[%s2076_s1 + $0xc8] sm:$0xff]   ;;  %v1681_v30 = vld [vmem:[%s2076_s1 + $0xc0] sm:$0xff]   ;;  %v1688_v36 = vld [vmem:[%s2076_s1 + $0x1f8] sm:$0xff]  }
  0x15   : > { %v1678_v27 = vld [vmem:[%s2076_s1 + $0x8] sm:$0xff]   ;;  %v1682_v31 = vld [vmem:[%s2076_s1] sm:$0xff]   ;;  %v1689_v37 = vld [vmem:[%s2076_s1 + $0x138] sm:$0xff]  }
  0x16   : > { %1480 = vmatpush3.bf16.msra.mxu0 %v1662_v11  ;;  %v1679_v28 = vld [vmem:[%s2076_s1 + $0x88] sm:$0xff]   ;;  %v1683_v32 = vld [vmem:[%s2076_s1 + $0x80] sm:$0xff]   ;;  %v1690_v38 = vld [vmem:[%s2076_s1 + $0x1b8] sm:$0xff]  }
  0x17   : > { %1508 = vmatpush3.bf16.msra.mxu1 %v1663_v12  ;;  %1481 = vmatprep.subr.bf16.mxu0 %v1664_v13  ;;  %v1684_v33 = vld [vmem:[%s1879_s18 + $0x4] ss:$8 sps:$4 sm:$0xff]   ;;  %v1889_v34 = vld [vmem:[%s1879_s18] ss:$8 sps:$4 sm:$0xff]   ;;  %v1691_v39 = vld [vmem:[%s2076_s1 + $0x170] sm:$0xff]  }
  0x18   : > { %1509 = vmatprep.subr.bf16.mxu1 %v1665_v14  ;;  %441 = vmatprep.mubr.bf16.mxu0 %v1684_v33  ;;  %v1692_v40 = vld [vmem:[%s2076_s1 + $0x1f0] sm:$0xff]   ;;  %v1695_v43 = vld [vmem:[%s2076_s1 + $0x168] sm:$0xff]   ;;  %v1699_v47 = vld [vmem:[%s2076_s1 + $0x160] sm:$0xff]  }
  0x19   : > { %619 = vmatprep.mubr.bf16.mxu1 %v1684_v33  ;;  %v1693_v41 = vld [vmem:[%s2076_s1 + $0x130] sm:$0xff]   ;;  %v1696_v44 = vld [vmem:[%s2076_s1 + $0x1e8] sm:$0xff]   ;;  %v1700_v48 = vld [vmem:[%s2076_s1 + $0x1e0] sm:$0xff]  }
  0x1a   : > { %1482 = vmatpush3.bf16.msra.mxu0 %v1666_v15  ;;  %v1694_v42 = vld [vmem:[%s2076_s1 + $0x1b0] sm:$0xff]   ;;  %v1697_v45 = vld [vmem:[%s2076_s1 + $0x128] sm:$0xff]   ;;  %v1701_v49 = vld [vmem:[%s2076_s1 + $0x120] sm:$0xff]  }
  0x1b   : > { %1510 = vmatpush3.bf16.msra.mxu1 %v1667_v16  ;;  %1483 = vmatprep.subr.bf16.mxu0 %v1668_v17  ;;  %v1698_v46 = vld [vmem:[%s2076_s1 + $0x1a8] sm:$0xff]   ;;  %v1702_v50 = vld [vmem:[%s2076_s1 + $0x1a0] sm:$0xff]   ;;  %v1703_v51 = vld [vmem:[%s2076_s1 + $0x158] sm:$0xff]  }
  0x1c   : > { %1511 = vmatprep.subr.bf16.mxu1 %v1669_v18  ;;  %v1704_v52 = vld [vmem:[%s2076_s1 + $0x1d8] sm:$0xff]   ;;  %v1710_v57 = vld [vmem:[%s2076_s1 + $0x150] sm:$0xff]   ;;  %v1714_v61 = vld [vmem:[%s2076_s1 + $0x148] sm:$0xff]  }
  0x1d   : > { %v1705_v53 = vld [vmem:[%s1879_s18 + $0x14] ss:$8 sps:$4 sm:$0xff]   ;;  %v1709_v56 = vld [vmem:[%s1879_s18 + $0x10] ss:$8 sps:$4 sm:$0xff]   ;;  %v1715_v62 = vld [vmem:[%s2076_s1 + $0x1c8] sm:$0xff]  }
  0x1e   : > { %1484 = vmatpush3.bf16.msra.mxu0 %v1670_v19  ;;  %v1707_v54 = vld [vmem:[%s2076_s1 + $0x118] sm:$0xff]   ;;  %v1711_v58 = vld [vmem:[%s2076_s1 + $0x1d0] sm:$0xff]   ;;  %v1716_v63 = vld [vmem:[%s2076_s1 + $0x108] sm:$0xff]  }
  0x1f   : > { %1512 = vmatpush3.bf16.msra.mxu1 %v1671_v20  ;;  %1485 = vmatprep.subr.bf16.mxu0 %v1672_v21  ;;  %v1708_v55 = vld [vmem:[%s2076_s1 + $0x198] sm:$0xff]   ;;  %v1712_v59 = vld [vmem:[%s2076_s1 + $0x110] sm:$0xff]   ;;  %v1717_v0 = vld [vmem:[%s2076_s1 + $0x188] sm:$0xff]  }
  0x20   : > { %1513 = vmatprep.subr.bf16.mxu1 %v1673_v22  ;;  %v1713_v60 = vld [vmem:[%s2076_s1 + $0x190] sm:$0xff]   ;;  %v1718_v1 = vld [vmem:[%s2076_s1 + $0x140] sm:$0xff]   ;;  %v1135_v7 = vld [vmem:[%s2079_s4 + $0x78] sm:$0xff] }
  0x21   : > { %v1719_v2 = vld [vmem:[%s2076_s1 + $0x1c0] sm:$0xff]   ;;  %v1134_v8 = vld [vmem:[%s2079_s4 + $0x70] sm:$0xff]  ;;  %v1133_v9 = vld [vmem:[%s2079_s4 + $0x68] sm:$0xff] }
  0x22   : > { %1486 = vmatpush3.bf16.msra.mxu0 %v1674_v23  ;;  %v1720_v3 = vld [vmem:[%s2076_s1 + $0x100] sm:$0xff]   ;;  %v1131_v11 = vld [vmem:[%s2079_s4 + $0x58] sm:$0xff]  ;;  %v1130_v12 = vld [vmem:[%s2079_s4 + $0x50] sm:$0xff] }
  0x23   : > { %1514 = vmatpush3.bf16.msra.mxu1 %v1675_v24  ;;  %1487 = vmatprep.subr.bf16.mxu0 %v1676_v25  ;;  %v1721_v4 = vld [vmem:[%s2076_s1 + $0x180] sm:$0xff]   ;;  %v1129_v13 = vld [vmem:[%s2079_s4 + $0x48] sm:$0xff]  ;;  %v1127_v15 = vld [vmem:[%s2079_s4 + $0x38] sm:$0xff] }
  0x24   : > { %1515 = vmatprep.subr.bf16.mxu1 %v1677_v26  ;;  %v1028_v5 = vld [vmem:[%s2078_s3] sm:$0x3f]  ;;  %v1126_v17 = vld [vmem:[%s2079_s4 + $0x30] sm:$0xff]  ;;  %v1125_v20 = vld [vmem:[%s2079_s4 + $0x28] sm:$0xff] }
  0x25   : > { %1046 = vperm.xlu0 %1651, %v1028_v5   ;;  %v1132_v10 = vld [vmem:[%s2079_s4 + $0x60] sm:$0xff]  ;;  %v1123_v24 = vld [vmem:[%s2079_s4 + $0x18] sm:$0xff] }
  0x26   : > { %1488 = vmatpush3.bf16.msra.mxu0 %v1678_v27  ;;  %v1128_v14 = vld [vmem:[%s2079_s4 + $0x40] sm:$0xff]  ;;  %v1122_v27 = vld [vmem:[%s2079_s4 + $0x10] sm:$0xff] }
  0x27   : > { %1516 = vmatpush3.bf16.msra.mxu1 %v1679_v28  ;;  %1489 = vmatprep.subr.bf16.mxu0 %v1680_v29  ;;  %v1124_v21 = vld [vmem:[%s2079_s4 + $0x20] sm:$0xff]  ;;  %v1121_v29 = vld [vmem:[%s2079_s4 + $0x8] sm:$0xff] }
  0x28   : > { %1517 = vmatprep.subr.bf16.mxu1 %v1681_v30  ;;  %v1120_v30 = vld [vmem:[%s2079_s4] sm:$0xff] }
  0x2a   : > { %1490 = vmatpush3.bf16.msra.mxu0 %v1682_v31 }
  0x2b   : > { %1518 = vmatpush3.bf16.msra.mxu1 %v1683_v32  ;;  %1531 = vmatprep.subr.bf16.mxu0 %v1687_v35 }
  0x2c   : > { %1559 = vmatprep.subr.bf16.mxu1 %v1688_v36 }
  0x2d   : > { %442 = vmatmul.mubr.bf16.vlgmr.msra.gmra.mxu0 %v1889_v34 }
  0x2e   : > { %620 = vmatmul.mubr.bf16.vlgmr.msra.gmra.mxu1 %v1889_v34  ;;  %1532 = vmatpush3.bf16.msra.mxu0 %v1689_v37 }
  0x2f   : > { %1560 = vmatpush3.bf16.msra.mxu1 %v1690_v38  ;;  %1533 = vmatprep.subr.bf16.mxu0 %v1691_v39 }
  0x30   : > { %1561 = vmatprep.subr.bf16.mxu1 %v1692_v40  ;;  %448 = vmatprep.mubr.bf16.mxu0 %v1705_v53 }
  0x31   : > { %626 = vmatprep.mubr.bf16.mxu1 %v1705_v53 }
  0x32   : > { %1534 = vmatpush3.bf16.msra.mxu0 %v1693_v41 }
  0x33   : > { %1562 = vmatpush3.bf16.msra.mxu1 %v1694_v42  ;;  %1535 = vmatprep.subr.bf16.mxu0 %v1695_v43 }
  0x34   : > { %1563 = vmatprep.subr.bf16.mxu1 %v1696_v44 }
  0x35   : > { %449 = vmatmul.mubr.bf16.gmra.mxu0 %v1709_v56 }
  0x36   : > { %1536 = vmatpush3.bf16.msra.mxu0 %v1697_v45  ;;  %627 = vmatmul.mubr.bf16.gmra.mxu1 %v1709_v56 }
  0x37   : > { %1564 = vmatpush3.bf16.msra.mxu1 %v1698_v46  ;;  %1537 = vmatprep.subr.bf16.mxu0 %v1699_v47 }
  0x38   : > { %1565 = vmatprep.subr.bf16.mxu1 %v1700_v48  ;;  %803 = vmatprep.mubr.bf16.mxu0 %v1684_v33 }
  0x39   : > { %996 = vmatprep.mubr.bf16.mxu1 %v1684_v33 }
  0x3a   : > { %1538 = vmatpush3.bf16.msra.mxu0 %v1701_v49 }
  0x3b   : > { %1566 = vmatpush3.bf16.msra.mxu1 %v1702_v50  ;;  %1539 = vmatprep.subr.bf16.mxu0 %v1703_v51 }
  0x3c   : > { %1567 = vmatprep.subr.bf16.mxu1 %v1704_v52 }
  0x3e   : > { %1540 = vmatpush3.bf16.msra.mxu0 %v1707_v54 }
  0x3f   : > { %1568 = vmatpush3.bf16.msra.mxu1 %v1708_v55  ;;  %1541 = vmatprep.subr.bf16.mxu0 %v1710_v57 }
  0x40   : > { %1569 = vmatprep.subr.bf16.mxu1 %v1711_v58 }
  0x42   : > { %1542 = vmatpush3.bf16.msra.mxu0 %v1712_v59 }
  0x43   : > { %1570 = vmatpush3.bf16.msra.mxu1 %v1713_v60  ;;  %1543 = vmatprep.subr.bf16.mxu0 %v1714_v61 }
  0x44   : > { %1571 = vmatprep.subr.bf16.mxu1 %v1715_v62 }
  0x46   : > { %1544 = vmatpush3.bf16.msra.mxu0 %v1716_v63 }
  0x47   : > { %1572 = vmatpush3.bf16.msra.mxu1 %v1717_v0  ;;  %1545 = vmatprep.subr.bf16.mxu0 %v1718_v1 }
  0x48   : > { %1573 = vmatprep.subr.bf16.mxu1 %v1719_v2 }
  0x4a   : > { %1546 = vmatpush3.bf16.msra.mxu0 %v1720_v3 }
  0x4b   : > { %1574 = vmatpush3.bf16.msra.mxu1 %v1721_v4  ;;  %1604 = vmatprep.subr.mxu0 %v1735_v6  ;;  %v1468_v4 = vld [vmem:[%s2077_s2] ss:$0 sm:$0xff] }
  0x4d   : > { %804 = vmatmul.mubr.bf16.vlgmr.msra.gmra.mxu0 %v1889_v34 }
  0x4e   : > { %997 = vmatmul.mubr.bf16.vlgmr.msra.gmra.mxu1 %v1889_v34  ;;  %811 = vmatprep.mubr.bf16.mxu0 %v1705_v53 }
  0x4f   : > { %1004 = vmatprep.mubr.bf16.mxu1 %v1705_v53  ;;  %1605 = vmatpush3.msra.mxu0 %v1135_v7 }
  0x50   : > { %1606 = vmatprep.subr.mxu0 %v1735_v6 }
  0x51   : > { %1607 = vmatpush3.msra.mxu0 %v1134_v8 }
  0x52   : > { %1608 = vmatprep.subr.mxu0 %v1735_v6 }
  0x53   : > { %1609 = vmatpush3.msra.mxu0 %v1133_v9 }
  0x54   : > { %1610 = vmatprep.subr.mxu0 %v1735_v6 }
  0x55   : > { %812 = vmatmul.mubr.bf16.gmra.mxu0 %v1709_v56 }
  0x56   : > { %1005 = vmatmul.mubr.bf16.gmra.mxu1 %v1709_v56  ;;  %1611 = vmatpush3.msra.mxu0 %v1132_v10 }
  0x57   : > { %1612 = vmatprep.subr.mxu0 %v1735_v6  ;;  %1636 = vmatprep.mubr.msk.f32.mxu0 %vm1736_vm0, %v1735_v6 }
  0x58   : > { %1613 = vmatpush3.msra.mxu0 %v1131_v11 }
  0x59   : > { %1614 = vmatprep.subr.mxu0 %v1735_v6 }
  0x5a   : > { %1615 = vmatpush3.msra.mxu0 %v1130_v12 }
  0x5b   : > { %1616 = vmatprep.subr.mxu0 %v1735_v6 }
  0x5c   : > { %1617 = vmatpush3.msra.mxu0 %v1129_v13 }
  0x5d   : > { %1618 = vmatprep.subr.mxu0 %v1735_v6 }
  0x5e   : > { %1619 = vmatpush3.msra.mxu0 %v1128_v14 }
  0x5f   : > { %1620 = vmatprep.subr.mxu0 %v1735_v6 }
  0x60   : > { %1621 = vmatpush3.msra.mxu0 %v1127_v15 }
  0x61   : > { %1622 = vmatprep.subr.mxu0 %v1735_v6 }
  0x62   : > { %1623 = vmatpush3.msra.mxu0 %v1126_v17 }
  0x63   : > { %1624 = vmatprep.subr.mxu0 %v1735_v6 }
  0x64   : > { %1625 = vmatpush3.msra.mxu0 %v1125_v20 }
  0x65   : > { %1626 = vmatprep.subr.mxu0 %v1735_v6 }
  0x66   : > { %1627 = vmatpush3.msra.mxu0 %v1124_v21 }
  0x67   : > { %1628 = vmatprep.subr.mxu0 %v1735_v6 }
  0x68   : > { %1629 = vmatpush3.msra.mxu0 %v1123_v24 }
  0x69   : > { %1630 = vmatprep.subr.mxu0 %v1735_v6 }
  0x6a   : > { %1631 = vmatpush3.msra.mxu0 %v1122_v27 }
  0x6b   : > { %1632 = vmatprep.subr.mxu0 %v1735_v6 }
  0x6c   : > { %1633 = vmatpush3.msra.mxu0 %v1121_v29 }
  0x6d   : > { %1634 = vmatprep.subr.mxu0 %v1735_v6 }
  0x6e   : > { %1635 = vmatpush3.msra.mxu0 %v1120_v30 }
  0xa0   : > { %v2049_v21 = vpop.permute.xlu0 %1046 }
  0xed   : > { %v1491_v16 = vpop.f32.mrf.mxu0 }
  0xee   : > { %v1519_v18 = vpop.f32.mrf.mxu1 }
  0xef   : > { %v1492_v19 = vpop.f32.mrf.mxu0 }
  0xf0   : > { %v1520_v22 = vpop.f32.mrf.mxu1  ;;  %v1493_v52 = vadd.f32 %v1492_v19, %v1491_v16 }
  0xf1   : > { %v1494_v23 = vpop.f32.mrf.mxu0  ;;  %v1521_v41 = vadd.f32 %v1520_v22, %v1519_v18 }
  0xf2   : > { %v1522_v25 = vpop.f32.mrf.mxu1 }
  0xf3   : > { %v1495_v26 = vpop.f32.mrf.mxu0  ;;  %v636_v47 = vrot.slane %v1521_v41, 1 }
  0xf4   : > { %v1523_v28 = vpop.f32.mrf.mxu1 }
  0xf5   : > { %v1497_v31 = vpop.f32.mrf.mxu0  ;;  %v640_v58 = vadd.f32 %v1493_v52, %v636_v47 }
  0xf6   : > { %v1525_v32 = vpop.f32.mrf.mxu1 }
  0xf7   : > { %v1498_v33 = vpop.f32.mrf.mxu0 }
  0xf8   : > { %v1526_v34 = vpop.f32.mrf.mxu1  ;;  %v1499_v7 = vadd.f32 %v1498_v33, %v1497_v31 }
  0xf9   : > { %v1500_v35 = vpop.f32.mrf.mxu0  ;;  %v1527_v59 = vadd.f32 %v1526_v34, %v1525_v32 }
  0xfa   : > { %v1528_v36 = vpop.f32.mrf.mxu1 }
  0xfb   : > { %v1501_v37 = vpop.f32.mrf.mxu0  ;;  %v637_v8 = vrot.slane %v1527_v59, 1 }
  0xfc   : > { %v1529_v38 = vpop.f32.mrf.mxu1 }
  0xfd   : > { %v641_v18 = vadd.f32 %v1499_v7, %v637_v8 }
 0x10d   : > { %v1547_v39 = vpop.f32.mrf.mxu0 }
 0x10e   : > { %v1575_v40 = vpop.f32.mrf.mxu1 }
 0x10f   : > { %v1548_v42 = vpop.f32.mrf.mxu0 }
 0x110   : > { %v1576_v43 = vpop.f32.mrf.mxu1  ;;  %v1549_v45 = vadd.f32 %v1548_v42, %v1547_v39 }
 0x111   : > { %v1550_v44 = vpop.f32.mrf.mxu0  ;;  %v1577_v49 = vadd.f32 %v1576_v43, %v1575_v40 }
 0x112   : > { %v1578_v46 = vpop.f32.mrf.mxu1  ;;  %v825_v55 = vrot.slane %v1549_v45, 3 }
 0x113   : > { %v1551_v48 = vpop.f32.mrf.mxu0  ;;  %v1018_v62 = vrot.slane %v1577_v49, 4 }
 0x114   : > { %v1552_v50 = vadd.f32 %v1551_v48, %v1550_v44  ;;  %v1579_v51 = vpop.f32.mrf.mxu1 }
 0x115   : > { %v1580_v53 = vadd.f32 %v1579_v51, %v1578_v46  ;;  %v1553_v54 = vpop.f32.mrf.mxu0 }
 0x116   : > { %v826_v56 = vrot.slane %v1552_v50, 3  ;;  %v1581_v57 = vpop.f32.mrf.mxu1 }
 0x117   : > { %v1019_v60 = vrot.slane %v1580_v53, 4  ;;  %v1554_v61 = vpop.f32.mrf.mxu0 }
 0x118   : > { %v827_v63 = vsel %vm824_vm1, %v825_v55, %v826_v56  ;;  %v1582_v0 = vpop.f32.mrf.mxu1  ;;  %v1555_v5 = vadd.f32 %v1554_v61, %v1553_v54 }
 0x119   : > { %v833_v1 = vadd.f32 %v827_v63, %v640_v58  ;;  %v1556_v2 = vpop.f32.mrf.mxu0  ;;  %v1020_v3 = vsel %vm1017_vm2, %v1018_v62, %v1019_v60  ;;  %v1583_v11 = vadd.f32 %v1582_v0, %v1581_v57 }
 0x11a   : > { %v1584_v6 = vpop.f32.mrf.mxu1  ;;  %v828_v16 = vrot.slane %v1555_v5, 3 }
 0x11b   : > { %v1026_v9 = vadd.f32 %v1020_v3, %v833_v1  ;;  %v1557_v10 = vpop.f32.mrf.mxu0  ;;  %v1021_v22 = vrot.slane %v1583_v11, 4 }
 0x11c   : > { %v1558_v12 = vadd.f32 %v1557_v10, %v1556_v2  ;;  %v1585_v13 = vpop.f32.mrf.mxu1 }
 0x11d   : > { %v1036_v14 = vadd.f32 %v1468_v4, %v1026_v9  ;;  %v1586_v15 = vadd.f32 %v1585_v13, %v1584_v6 }
 0x11e   : > { %v829_v17 = vrot.slane %v1558_v12, 3 }
 0x11f   : > { %v1040_v19 = vmul.f32 0.2, %v1036_v14  ;;  %v1022_v20 = vrot.slane %v1586_v15, 4  ;;  %vm1038_vm3 = vcmp.ge.f32.partialorder %v1036_v14, 0.0 }
 0x120   : > { %v830_v23 = vsel %vm824_vm1, %v828_v16, %v829_v17 }
 0x121   : > { %v834_v24 = vadd.f32 %v830_v23, %v641_v18  ;;  %v1042_v25 = vsel %vm1038_vm3, %v1036_v14, %v1040_v19  ;;  %v1023_v26 = vsel %vm1017_vm2, %v1021_v22, %v1022_v20 }
 0x122   : > { %v1049_v27 = vmul.f32 %v2049_v21, %v1042_v25 }
 0x123   : > { %v1027_v28 = vadd.f32 %v1023_v26, %v834_v24 }
 0x124   : > { %v1052_v29 = vsel %vm1051_vm4, %v1049_v27, 0.0 }
 0x125   : > { %v1037_v30 = vadd.f32 %v1468_v4, %v1027_v28  ;;  %v1053_v31 = vrot.slane %v1052_v29, 4 }
 0x127   : > { %v1041_v32 = vmul.f32 0.2, %v1037_v30  ;;  %vm1039_vm5 = vcmp.ge.f32.partialorder %v1037_v30, 0.0  ;;  %v1054_v33 = vadd.f32 %v1053_v31, %v1052_v29 }
 0x129   : > { %v1043_v34 = vsel %vm1039_vm5, %v1037_v30, %v1041_v32  ;;  %v1055_v35 = vrot.slane %v1054_v33, 2 }
 0x12a   : > { %v1050_v36 = vmul.f32 %v2049_v21, %v1043_v34 }
 0x12b   : > { %v1056_v37 = vadd.f32 %v1055_v35, %v1054_v33 }
 0x12c   : > { %v1059_v38 = vsel %vm1051_vm4, %v1050_v36, 0.0 }
 0x12d   : > { %v1057_v39 = vrot.slane %v1056_v37, 1  ;;  %v1060_v40 = vrot.slane %v1059_v38, 4 }
 0x12f   : > { %v1058_v41 = vadd.f32 %v1057_v39, %v1056_v37  ;;  %v1061_v42 = vadd.f32 %v1060_v40, %v1059_v38  ;;  %v1737_v37 = vmov 1966171168  }
 0x130   : > { %v1220_v38 = vunpack.c.l.s4 %v1737_v37 }
 0x131   : > { %v1062_v43 = vrot.slane %v1061_v42, 2  ;;  %v1066_v44 = vmul.f32 0.25, %v1058_v41  ;;  %v1469_v41 = vld [vmem:[%s2080_s5] ss:$0 sm:$0xff] }
 0x132   : > { %v1221_v39 = vunpack.c.0.s8 %v1220_v38 }
 0x133   : > { %v1063_v45 = vadd.f32 %v1062_v43, %v1061_v42  ;;  %v1068_v46 = vsub.f32 %v1042_v25, %v1066_v44 }
 0x135   : > { %v1064_v47 = vrot.slane %v1063_v45, 1  ;;  %v1070_v48 = vmul.f32 %v1068_v46, %v1068_v46 }
 0x137   : > { %v1065_v49 = vadd.f32 %v1064_v47, %v1063_v45  ;;  %v1072_v50 = vmul.f32 %v1070_v48, %v2049_v21 }
 0x139   : > { %v1067_v51 = vmul.f32 0.25, %v1065_v49  ;;  %v1074_v52 = vsel %vm1051_vm4, %v1072_v50, 0.0 }
 0x13a   : > { %v1075_v53 = vrot.slane %v1074_v52, 4 }
 0x13b   : > { %v1069_v54 = vsub.f32 %v1043_v34, %v1067_v51 }
 0x13c   : > { %v1076_v55 = vadd.f32 %v1075_v53, %v1074_v52 }
 0x13d   : > { %v1071_v56 = vmul.f32 %v1069_v54, %v1069_v54 }
 0x13e   : > { %v1077_v57 = vrot.slane %v1076_v55, 2 }
 0x13f   : > { %v1073_v58 = vmul.f32 %v1071_v56, %v2049_v21 }
 0x140   : > { %v1078_v59 = vadd.f32 %v1077_v57, %v1076_v55 }
 0x141   : > { %v1081_v60 = vsel %vm1051_vm4, %v1073_v58, 0.0 }
 0x142   : > { %v1079_v61 = vrot.slane %v1078_v59, 1  ;;  %v1082_v62 = vrot.slane %v1081_v60, 4 }
 0x144   : > { %v1080_v63 = vadd.f32 %v1079_v61, %v1078_v59  ;;  %v1083_v0 = vadd.f32 %v1082_v62, %v1081_v60 }
 0x146   : > { %v1084_v1 = vrot.slane %v1083_v0, 2  ;;  %v1088_v2 = vmul.f32 0.25, %v1080_v63 }
 0x148   : > { %v1085_v3 = vadd.f32 %v1084_v1, %v1083_v0  ;;  %v1090_v4 = vadd.f32 1e-06, %v1088_v2 }
 0x14a   : > { %v1086_v5 = vrot.slane %v1085_v3, 1  ;;  %1722 = vrsqrt.f32 %v1090_v4 }
 0x14c   : > { %v1087_v6 = vadd.f32 %v1086_v5, %v1085_v3 }
 0x14e   : > { %v1089_v7 = vmul.f32 0.25, %v1087_v6 }
 0x150   : > { %v1091_v8 = vadd.f32 1e-06, %v1089_v7 }
 0x152   : > { %1724 = vrsqrt.f32 %v1091_v8 }
 0x157   : > { %v1723_v9 = vpop.eup %1722 }
 0x158   : > { %v1094_v10 = vmul.f32 %v1723_v9, %v1068_v46 }
 0x15a   : > { %vm1096_vm6 = vcmp.ge.f32.partialorder %v1094_v10, 0.0  ;;  %v1098_v11 = vmul.f32 0.2, %v1094_v10 }
 0x15c   : > { %v1100_v12 = vsel %vm1096_vm6, %v1094_v10, %v1098_v11 }
 0x15d   : > { %v1102_v13 = vmul.f32 %v1100_v12, %v2049_v21 }
 0x15f   : > { %v1725_v14 = vpop.eup %1724  ;;  %v1104_v15 = vsel %vm1051_vm4, %v1102_v13, 0.0 }
 0x160   : > { %v1095_v16 = vmul.f32 %v1725_v14, %v1069_v54  ;;  %v1105_v17 = vrot.slane %v1104_v15, 4 }
 0x162   : > { %vm1097_vm7 = vcmp.ge.f32.partialorder %v1095_v16, 0.0  ;;  %v1099_v18 = vmul.f32 0.2, %v1095_v16  ;;  %v1106_v19 = vadd.f32 %v1105_v17, %v1104_v15 }
 0x164   : > { %v1101_v20 = vsel %vm1097_vm7, %v1095_v16, %v1099_v18  ;;  %v1107_v22 = vrot.slane %v1106_v19, 2 }
 0x165   : > { %v1103_v23 = vmul.f32 %v1101_v20, %v2049_v21  ;;  %v1222_v21 = vlaneseq }
 0x166   : > { %v1108_v26 = vadd.f32 %v1107_v22, %v1106_v19 }
 0x167   : > { %v1111_v24 = vsel %vm1051_vm4, %v1103_v23, 0.0  ;;  %v1223_v40 = vshrl.u32 %v1222_v21, 7 }
 0x168   : > { %v1112_v25 = vrot.slane %v1111_v24, 4  ;;  %v1109_v29 = vrot.slane %v1108_v26, 1 }
 0x169   : > { %v1224_v42 = vsub.s32 %v1221_v39, %v1223_v40 }
 0x16a   : > { %v1113_v27 = vadd.f32 %v1112_v25, %v1111_v24  ;;  %v1110_v31 = vadd.f32 %v1109_v29, %v1108_v26 }
 0x16c   : > { %v1114_v28 = vrot.slane %v1113_v27, 2  ;;  %v1118_v34 = vmul.f32 0.25, %v1110_v31 }
 0x16e   : > { %v1115_v30 = vadd.f32 %v1114_v28, %v1113_v27 }
 0x170   : > { %v1116_v32 = vrot.slane %v1115_v30, 1 }
 0x172   : > { %v1117_v33 = vadd.f32 %v1116_v32, %v1115_v30 }
 0x174   : > { %v1119_v35 = vmul.f32 0.25, %v1117_v33 }
 0x176   : > { %v1146_v36 = vsel %vm1145_vm8, %v1119_v35, %v1118_v34 }
 0x177   : > { %1637 = vmatmul.mubr.f32.vlgmr.msra.gmra.mxu0 %v1146_v36 }
 0x237   : > { %v1214_v43 = vpop.f32.mrf.mxu0 }
 0x238   : > { %v1215_v44 = vadd.f32 %v1469_v41, %v1214_v43 }
 0x239   : > { %v1638_v45 = vpop.f32.mrf.mxu0 }
 0x23a   : > { %v1225_v46 = vrot.slane %v1215_v44, %v1224_v42 }
 0x23c   : > { %v1226_v47 = vcombine.high %v1225_v46, %v1225_v46  ;;  %1470 = vst.sshfl [vmem:[%s254_s19] sm:$0x1 pattern:$0x73625140] %v1225_v46 }
 0x23e   : > { %1471 = vst.sshfl [vmem:[%s254_s19 + $0x1] sm:$0x1 pattern:$0x73625140] %v1226_v47 }
 0x23f PF: > { %s16_s21 = sadd.s32 1, %s1732_s21  }
 0x240   : > { %p13_p4 = scmp.ge.s32.totalorder %s16_s21, 4  }
 0x242   :  { %15 = sbr.rel (!%p13_p4) target bundleno = 1 (0x1), region = 77 }

</bundles_post_ra>
